<compile_context>
chip_gen: v6e
topology: v6e:2x2x1
jax: 0.10.0
libtpu: 0.0.40
codegen_flags: <defaults>
</compile_context>

<pallas_src>
import jax
import jax.numpy as jnp
from jax.experimental import pallas as pl
from jax.experimental.pallas import tpu as pltpu

NFEAT = 4
NHID = 32
NLAYERS = 3
BN_EPS = 1e-5
NEG_BIG = -1e30
PW = 128          # lane-dense width of the packed parameter buffer / output slab


def _round_up(n, m):
    return ((n + m - 1) // m) * m


def _pad2(a, r, c):
    a = jnp.asarray(a, jnp.float32)
    return jnp.zeros((r, c), jnp.float32).at[:a.shape[0], :a.shape[1]].set(a)


# ----------------------------------------------------------------------------- kernel
def _make_gin_kernel(offs, n_real, n_pad, nlayers, nhid):
    inv_n = 1.0 / float(n_real)

    def kernel(scal_ref, a_ref, x_ref, bt_ref, btT_ref, par_ref, out_ref):
        f32 = jnp.float32

        def getp(name):                      # static slice into the packed param buffer
            o, r, c = offs[name]
            return par_ref[o:o + r, 0:c]

        def mxu(a, b):                       # MXU: bf16 operands, f32 accumulate
            return jnp.dot(a.astype(jnp.bfloat16), b.astype(jnp.bfloat16),
                           preferred_element_type=f32)

        def mmf(a, b):                       # tiny gate / pooling matmuls kept in f32
            return jnp.dot(a, b, preferred_element_type=f32)

        # validity mask over padded node rows (BN stats / pooling use real nodes only)
        rows = jax.lax.broadcasted_iota(jnp.int32, (n_pad, nhid), 0)
        mask = (rows < n_real).astype(f32)                   # [n_pad, nhid]
        valid = mask[:, 0:1]                                 # [n_pad, 1]

        def bn_train(z, gamma, beta):
            # single-pass masked batch statistics (training-mode BatchNorm1d, biased var)
            zm = z * mask
            mu = jnp.sum(zm, axis=0, keepdims=True) * inv_n
            ex2 = jnp.sum(zm * z, axis=0, keepdims=True) * inv_n
            var = jnp.maximum(ex2 - mu * mu, 0.0)            # guard against f32 cancellation
            return (z - mu) * jax.lax.rsqrt(var + BN_EPS) * gamma + beta

        A = a_ref[...]                                       # bf16, loaded once (no per-layer cast)
        x = x_ref[...]                                       # f32 [n_pad, nhid] (feature cols zero-padded)

        # ---- conv1: GINConv(Linear-ReLU-Linear-ReLU), train_eps (eps init 0) ----
        h = (1.0 + scal_ref[0]) * x + mxu(A, x)
        h = jnp.maximum(mxu(h, getp("w1a")) + getp("b1a"), 0.0)
        h = jnp.maximum(mxu(h, getp("w1b")) + getp("b1b"), 0.0)
        hs = [h]

        # ---- convs: GINConv(Linear-BN-ReLU-Linear-BN-ReLU) ----
        # TODO(synk): for graphs beyond a few thousand padded nodes, stream A from HBM
        # (reduction grid / emit_pipeline over column blocks of A) instead of keeping it resident.
        for l in range(nlayers - 1):
            z = (1.0 + scal_ref[l + 1]) * h + mxu(A, h)
            z = mxu(z, getp(f"wa{l}")) + getp(f"ba{l}")
            z = jnp.maximum(bn_train(z, getp(f"ga{l}"), getp(f"bta{l}")), 0.0)
            z = mxu(z, getp(f"wb{l}")) + getp(f"bb{l}")
            h = jnp.maximum(bn_train(z, getp(f"gb{l}"), getp(f"btb{l}")), 0.0)
            hs.append(h)

        # ---- jumping knowledge: relu(lin1(concat(hs))) == relu(sum_l hs[l] @ wlin_l + blin) ----
        acc = getp("blin")
        for l, hl in enumerate(hs):
            acc = acc + mxu(hl, getp(f"wlin{l}"))
        h = jnp.maximum(acc, 0.0)                            # [n_pad, nhid]

        # ---- attentional aggregation: per-graph softmax(gate_nn(h)) weighted sum ----
        bt = bt_ref[...].astype(f32)                         # [g_pad, n_pad] (0/1, exact from bf16)
        btT = btT_ref[...].astype(f32)                       # [n_pad, g_pad]
        gate = mmf(h, getp("wg")) + scal_ref[nlayers]        # [n_pad, 1]
        masked = jnp.where(btT > 0.0, gate, NEG_BIG)         # [n_pad, g_pad]
        maxg = jnp.max(masked, axis=0, keepdims=True)        # [1, g_pad]  per-graph max
        shift = jnp.sum(btT * maxg, axis=1, keepdims=True)   # [n_pad, 1]  max of own graph
        # mask BEFORE exp: padded-row gates are garbage and may overflow exp otherwise
        e = jnp.exp(jnp.where(valid > 0.0, gate - shift, NEG_BIG))   # [n_pad, 1]
        denom = jnp.maximum(mmf(bt, e), 1e-30)               # [g_pad, 1]  empty-graph guard
        pooled = mmf(bt, e * h) / denom                      # [g_pad, nhid]

        # ---- pred_layer: Linear + ReLU (dropout p=0.0 is identity); lane-dense output ----
        out = jnp.maximum(mxu(pooled, getp("wp")) + getp("bp"), 0.0)    # [g_pad, 128]
        out_ref[...] = out.astype(out_ref.dtype)

    return kernel


# ----------------------------------------------------------------------------- params
def _pack_params(params):
    """Pack all static weights/biases/BN params into one [R, 128] f32 buffer (done once)."""
    H, L = NHID, NLAYERS - 1
    pieces = [
        ("w1a", _pad2(params["w1a"], H, H)),     # rows NFEAT..H zero (matches x zero-padded cols)
        ("b1a", params["b1a"]),
        ("w1b", params["w1b"]),
        ("b1b", params["b1b"]),
    ]
    for l in range(L):
        pieces += [(f"wa{l}", params["wca"][l]), (f"ba{l}", params["bca"][l]),
                   (f"ga{l}", params["ga"][l]), (f"bta{l}", params["bta"][l]),
                   (f"wb{l}", params["wcb"][l]), (f"bb{l}", params["bcb"][l]),
                   (f"gb{l}", params["gb"][l]), (f"btb{l}", params["btb"][l])]
    for l in range(NLAYERS):
        pieces.append((f"wlin{l}", params["wlin"][l * H:(l + 1) * H]))
    pieces += [("blin", params["blin"]), ("wg", params["wg"]),
               ("wp", _pad2(params["wp"], H, PW)),           # pad pred weights -> 128-wide output
               ("bp", _pad2(params["bp"], 1, PW))]

    offs, chunks, off = {}, [], 0
    for name, arr in pieces:
        arr = jnp.asarray(arr, jnp.float32)
        r, c = arr.shape
        r8 = _round_up(r, 8)                                 # 8-aligned (sublane) row offsets
        offs[name] = (off, r, c)
        chunks.append(_pad2(arr, r8, PW))
        off += r8
    return jnp.concatenate(chunks, axis=0), offs             # ~240 KB, packed once


def make_gin_forward(params):
    """Pre-pack static parameters once and return a jitted forward(x, A, bt)."""
    par_buf, offs = _pack_params(params)
    scal = jnp.concatenate([jnp.asarray(params["eps"], jnp.float32).reshape(-1),
                            jnp.asarray(params["bg"], jnp.float32).reshape(-1)])  # [eps0..2, bg]

    @jax.jit
    def forward(x, A, bt):
        f32, bf16 = jnp.float32, jnp.bfloat16
        N, G, H = x.shape[0], bt.shape[0], NHID
        n_pad, g_pad = _round_up(N, 8), _round_up(G, 8)

        # Per-batch graph data at NATURAL widths; O(N^2)/O(N*G) pieces in bf16 (exact).
        A_bf = _pad2(A, n_pad, n_pad).astype(bf16)
        x_f = _pad2(x[:, :NFEAT], n_pad, H)
        bt_bf = _pad2(bt, g_pad, n_pad).astype(bf16)
        btT_bf = _pad2(bt.T, n_pad, g_pad).astype(bf16)

        in_bytes = (A_bf.size * 2 + x_f.size * 4 + bt_bf.size * 2 + btT_bf.size * 2
                    + par_buf.size * 4 + g_pad * PW * 4)
        vmem_limit = int(min(64 << 20, max(3 * in_bytes + (2 << 20), 16 << 20)))

        kernel = _make_gin_kernel(offs, N, n_pad, NLAYERS, H)
        out = pl.pallas_call(
            kernel,
            out_shape=jax.ShapeDtypeStruct((g_pad, PW), f32),
            in_specs=[pl.BlockSpec(memory_space=pltpu.MemorySpace.SMEM)]
                     + [pl.BlockSpec(memory_space=pltpu.MemorySpace.VMEM)] * 5,
            out_specs=pl.BlockSpec(memory_space=pltpu.MemorySpace.VMEM),
            compiler_params=pltpu.CompilerParams(vmem_limit_bytes=vmem_limit),
        )(scal, A_bf, x_f, bt_bf, btT_bf, par_buf)
        # TODO(synk): for real throughput, batch many graph-batches per call with a leading
        # ("parallel",) grid axis so both v7x TensorCores are used and M grows past 128.
        return out[:G, :H]

    return forward


# ----------------------------------------------------------------------------- reference
def gin_forward_ref(x, A, bt, p):
    # Pure-JAX reference mirroring the kernel math (bf16 MXU operands, f32 accumulate,
    # per-graph softmax pooling as in PyG AttentionalAggregation).
    def mmq(a, b):
        return jnp.dot(a.astype(jnp.bfloat16), b.astype(jnp.bfloat16),
                       preferred_element_type=jnp.float32)

    def bn(z, gamma, beta):
        mu = jnp.mean(z, axis=0, keepdims=True)
        var = jnp.maximum(jnp.mean(z * z, axis=0, keepdims=True) - mu * mu, 0.0)
        return (z - mu) * jax.lax.rsqrt(var + BN_EPS) * gamma + beta

    x = x[:, :NFEAT]
    h = (1.0 + p["eps"][0]) * x + mmq(A, x)
    h = jax.nn.relu(mmq(h, p["w1a"]) + p["b1a"])
    h = jax.nn.relu(mmq(h, p["w1b"]) + p["b1b"])
    hs = [h]
    for l in range(NLAYERS - 1):
        z = (1.0 + p["eps"][l + 1]) * h + mmq(A, h)
        z = mmq(z, p["wca"][l]) + p["bca"][l]
        z = jax.nn.relu(bn(z, p["ga"][l], p["bta"][l]))
        z = mmq(z, p["wcb"][l]) + p["bcb"][l]
        h = jax.nn.relu(bn(z, p["gb"][l], p["btb"][l]))
        hs.append(h)
    hcat = jnp.concatenate(hs, axis=1)
    h = jax.nn.relu(mmq(hcat, p["wlin"]) + p["blin"])

    gate = h @ p["wg"] + p["bg"]                             # [N, 1]
    masked = jnp.where(bt.T > 0, gate, -jnp.inf)             # [N, G]
    shift = jnp.sum(bt.T * masked.max(axis=0, keepdims=True), axis=1, keepdims=True)
    e = jnp.exp(gate - shift)                                # [N, 1]
    denom = bt @ e                                           # [G, 1]
    pooled = (bt @ (e * h)) / denom                          # [G, H]
    return jax.nn.relu(mmq(pooled, p["wp"]) + p["bp"])


def init_params(key):
    H, F, L = NHID, NFEAT, NLAYERS - 1
    keys = iter(jax.random.split(key, 32))

    def lin(fin, fout):
        bound = 1.0 / (fin ** 0.5)
        W = jax.random.uniform(next(keys), (fin, fout), jnp.float32, -bound, bound)
        b = jax.random.uniform(next(keys), (1, fout), jnp.float32, -bound, bound)
        return W, b

    p = {}
    p["eps"] = jnp.zeros((NLAYERS,), jnp.float32)            # train_eps, init 0
    p["w1a"], p["b1a"] = lin(F, H)
    p["w1b"], p["b1b"] = lin(H, H)
    wca, bca, wcb, bcb = [], [], [], []
    for _ in range(L):
        Wa, ba = lin(H, H)
        Wb, bb = lin(H, H)
        wca.append(Wa); bca.append(ba); wcb.append(Wb); bcb.append(bb)
    p["wca"] = jnp.stack(wca); p["bca"] = jnp.stack(bca)     # [L, H, H], [L, 1, H]
    p["wcb"] = jnp.stack(wcb); p["bcb"] = jnp.stack(bcb)
    p["ga"] = jnp.ones((L, 1, H), jnp.float32);  p["bta"] = jnp.zeros((L, 1, H), jnp.float32)
    p["gb"] = jnp.ones((L, 1, H), jnp.float32);  p["btb"] = jnp.zeros((L, 1, H), jnp.float32)
    p["wlin"], p["blin"] = lin(NLAYERS * H, H)
    p["wg"], p["bg"] = lin(H, 1)                             # attention gate_nn
    p["wp"], p["bp"] = lin(H, H)                             # pred_layer
    return p


if __name__ == "__main__":
    key = jax.random.PRNGKey(0)
    kx, kp = jax.random.split(key)

    N, G = 12, 2
    x_raw = jax.random.normal(kx, (N, 6), jnp.float32)
    x = x_raw[:, :NFEAT]                                     # x = x[:, :num_features]
    batch = jnp.array([0] * 6 + [1] * 6, jnp.int32)

    # two 6-node rings (both directions) as edge_index [2, E]
    src, dst = [], []
    for g0 in (0, 6):
        for i in range(6):
            a, b = g0 + i, g0 + (i + 1) % 6
            src += [a, b]
            dst += [b, a]
    edge_index = jnp.array([src, dst], jnp.int32)

    # dense adjacency: agg[i] = sum_{e: dst[e]==i} x[src[e]]
    A = jnp.zeros((N, N), jnp.float32).at[edge_index[1], edge_index[0]].add(1.0)
    bt = (batch[None, :] == jnp.arange(G)[:, None]).astype(jnp.float32)   # [G, N]

    params = init_params(kp)

    gin_forward = make_gin_forward(params)                   # packs parameters ONCE
    out = gin_forward(x, A, bt)
    jax.block_until_ready(out)

    ref = gin_forward_ref(x, A, bt, params)
    assert out.shape == (G, NHID), out.shape
    assert bool(jnp.all(jnp.isfinite(out))), out
    assert jnp.allclose(out, ref, atol=2e-3, rtol=2e-3), (out, ref)
    print("KERNEL_OK")
</pallas_src>

<mosaic_0001>
module attributes {stable_mosaic.version = 11 : i64} {
  func.func @kernel(%arg0: memref<4xf32, #tpu.memory_space<smem>>, %arg1: memref<16x16xbf16, #tpu.memory_space<vmem>>, %arg2: memref<16x32xf32, #tpu.memory_space<vmem>>, %arg3: memref<8x16xbf16, #tpu.memory_space<vmem>>, %arg4: memref<16x8xbf16, #tpu.memory_space<vmem>>, %arg5: memref<480x128xf32, #tpu.memory_space<vmem>>, %arg6: memref<8x128xf32, #tpu.memory_space<vmem>>) attributes {dimension_semantics = [], scalar_prefetch = 0 : i64, scratch_operands = 0 : i64, tpu.core_type = #tpu.core_type<tc>} {
    %0 = tpu.iota {dimensions = array<i32: 0>} : vector<16x32xi32>
    %c12_i32 = arith.constant 12 : i32
    %1 = vector.broadcast %c12_i32 : i32 to vector<16x32xi32>
    %2 = arith.cmpi slt, %0, %1 : vector<16x32xi32>
    %3 = arith.extui %2 : vector<16x32xi1> to vector<16x32xi32>
    %4 = arith.sitofp %3 : vector<16x32xi32> to vector<16x32xf32>
    %5 = vector.extract_strided_slice %4 {offsets = [0, 0], sizes = [16, 1], strides = [1, 1]} : vector<16x32xf32> to vector<16x1xf32>
    %c0 = arith.constant 0 : index
    %c0_0 = arith.constant 0 : index
    %6 = vector.load %arg1[%c0, %c0_0] : memref<16x16xbf16, #tpu.memory_space<vmem>>, vector<16x16xbf16>
    %c0_1 = arith.constant 0 : index
    %c0_2 = arith.constant 0 : index
    %7 = vector.load %arg2[%c0_1, %c0_2] : memref<16x32xf32, #tpu.memory_space<vmem>>, vector<16x32xf32>
    %c0_3 = arith.constant 0 : index
    %8 = memref.load %arg0[%c0_3] : memref<4xf32, #tpu.memory_space<smem>>
    %cst = arith.constant 1.000000e+00 : f32
    %9 = arith.addf %cst, %8 : f32
    %10 = vector.broadcast %9 : f32 to vector<16x32xf32>
    %11 = arith.mulf %10, %7 : vector<16x32xf32>
    %12 = arith.truncf %7 : vector<16x32xf32> to vector<16x32xbf16>
    %cst_4 = arith.constant dense<0.000000e+00> : vector<16x32xf32>
    %13 = tpu.matmul %6, %12, %cst_4 {dimension_numbers = #tpu.dot_dimension_numbers<[1], [0], [0], [1], [0, 0, 1, 1], [], []>} : vector<16x16xbf16>, vector<16x32xbf16>, vector<16x32xf32> -> vector<16x32xf32>
    %14 = arith.addf %11, %13 : vector<16x32xf32>
    %c0_5 = arith.constant 0 : index
    %c0_6 = arith.constant 0 : index
    %15 = vector.load %arg5[%c0_5, %c0_6] : memref<480x128xf32, #tpu.memory_space<vmem>>, vector<32x32xf32>
    %16 = arith.truncf %14 : vector<16x32xf32> to vector<16x32xbf16>
    %17 = arith.truncf %15 : vector<32x32xf32> to vector<32x32xbf16>
    %cst_7 = arith.constant dense<0.000000e+00> : vector<16x32xf32>
    %18 = tpu.matmul %16, %17, %cst_7 {dimension_numbers = #tpu.dot_dimension_numbers<[1], [0], [0], [1], [0, 0, 1, 1], [], []>} : vector<16x32xbf16>, vector<32x32xbf16>, vector<16x32xf32> -> vector<16x32xf32>
    %c32 = arith.constant 32 : index
    %c0_8 = arith.constant 0 : index
    %19 = vector.load %arg5[%c32, %c0_8] : memref<480x128xf32, #tpu.memory_space<vmem>>, vector<1x32xf32>
    %20 = vector.broadcast %19 : vector<1x32xf32> to vector<16x32xf32>
    %21 = arith.addf %18, %20 : vector<16x32xf32>
    %cst_9 = arith.constant 0.000000e+00 : f32
    %22 = vector.broadcast %cst_9 : f32 to vector<16x32xf32>
    %23 = arith.maximumf %21, %22 : vector<16x32xf32>
    %c40 = arith.constant 40 : index
    %c0_10 = arith.constant 0 : index
    %24 = vector.load %arg5[%c40, %c0_10] : memref<480x128xf32, #tpu.memory_space<vmem>>, vector<32x32xf32>
    %25 = arith.truncf %23 : vector<16x32xf32> to vector<16x32xbf16>
    %26 = arith.truncf %24 : vector<32x32xf32> to vector<32x32xbf16>
    %cst_11 = arith.constant dense<0.000000e+00> : vector<16x32xf32>
    %27 = tpu.matmul %25, %26, %cst_11 {dimension_numbers = #tpu.dot_dimension_numbers<[1], [0], [0], [1], [0, 0, 1, 1], [], []>} : vector<16x32xbf16>, vector<32x32xbf16>, vector<16x32xf32> -> vector<16x32xf32>
    %c72 = arith.constant 72 : index
    %c0_12 = arith.constant 0 : index
    %28 = vector.load %arg5[%c72, %c0_12] : memref<480x128xf32, #tpu.memory_space<vmem>>, vector<1x32xf32>
    %29 = vector.broadcast %28 : vector<1x32xf32> to vector<16x32xf32>
    %30 = arith.addf %27, %29 : vector<16x32xf32>
    %cst_13 = arith.constant 0.000000e+00 : f32
    %31 = vector.broadcast %cst_13 : f32 to vector<16x32xf32>
    %32 = arith.maximumf %30, %31 : vector<16x32xf32>
    %c1 = arith.constant 1 : index
    %33 = memref.load %arg0[%c1] : memref<4xf32, #tpu.memory_space<smem>>
    %cst_14 = arith.constant 1.000000e+00 : f32
    %34 = arith.addf %cst_14, %33 : f32
    %35 = vector.broadcast %34 : f32 to vector<16x32xf32>
    %36 = arith.mulf %35, %32 : vector<16x32xf32>
    %37 = arith.truncf %32 : vector<16x32xf32> to vector<16x32xbf16>
    %cst_15 = arith.constant dense<0.000000e+00> : vector<16x32xf32>
    %38 = tpu.matmul %6, %37, %cst_15 {dimension_numbers = #tpu.dot_dimension_numbers<[1], [0], [0], [1], [0, 0, 1, 1], [], []>} : vector<16x16xbf16>, vector<16x32xbf16>, vector<16x32xf32> -> vector<16x32xf32>
    %39 = arith.addf %36, %38 : vector<16x32xf32>
    %c80 = arith.constant 80 : index
    %c0_16 = arith.constant 0 : index
    %40 = vector.load %arg5[%c80, %c0_16] : memref<480x128xf32, #tpu.memory_space<vmem>>, vector<32x32xf32>
    %41 = arith.truncf %39 : vector<16x32xf32> to vector<16x32xbf16>
    %42 = arith.truncf %40 : vector<32x32xf32> to vector<32x32xbf16>
    %cst_17 = arith.constant dense<0.000000e+00> : vector<16x32xf32>
    %43 = tpu.matmul %41, %42, %cst_17 {dimension_numbers = #tpu.dot_dimension_numbers<[1], [0], [0], [1], [0, 0, 1, 1], [], []>} : vector<16x32xbf16>, vector<32x32xbf16>, vector<16x32xf32> -> vector<16x32xf32>
    %c112 = arith.constant 112 : index
    %c0_18 = arith.constant 0 : index
    %44 = vector.load %arg5[%c112, %c0_18] : memref<480x128xf32, #tpu.memory_space<vmem>>, vector<1x32xf32>
    %45 = vector.broadcast %44 : vector<1x32xf32> to vector<16x32xf32>
    %46 = arith.addf %43, %45 : vector<16x32xf32>
    %c120 = arith.constant 120 : index
    %c0_19 = arith.constant 0 : index
    %47 = vector.load %arg5[%c120, %c0_19] : memref<480x128xf32, #tpu.memory_space<vmem>>, vector<1x32xf32>
    %c128 = arith.constant 128 : index
    %c0_20 = arith.constant 0 : index
    %48 = vector.load %arg5[%c128, %c0_20] : memref<480x128xf32, #tpu.memory_space<vmem>>, vector<1x32xf32>
    %49 = arith.mulf %46, %4 : vector<16x32xf32>
    %cst_21 = arith.constant dense<0.000000e+00> : vector<32xf32>
    %50 = vector.multi_reduction <add>, %49, %cst_21 [0] : vector<16x32xf32> to vector<32xf32>
    %51 = vector.shape_cast %50 : vector<32xf32> to vector<1x32xf32>
    %cst_22 = arith.constant 0.0833333358 : f32
    %52 = vector.broadcast %cst_22 : f32 to vector<1x32xf32>
    %53 = arith.mulf %51, %52 : vector<1x32xf32>
    %54 = arith.mulf %49, %46 : vector<16x32xf32>
    %cst_23 = arith.constant dense<0.000000e+00> : vector<32xf32>
    %55 = vector.multi_reduction <add>, %54, %cst_23 [0] : vector<16x32xf32> to vector<32xf32>
    %56 = vector.shape_cast %55 : vector<32xf32> to vector<1x32xf32>
    %cst_24 = arith.constant 0.0833333358 : f32
    %57 = vector.broadcast %cst_24 : f32 to vector<1x32xf32>
    %58 = arith.mulf %56, %57 : vector<1x32xf32>
    %59 = arith.mulf %53, %53 : vector<1x32xf32>
    %60 = arith.subf %58, %59 : vector<1x32xf32>
    %cst_25 = arith.constant 0.000000e+00 : f32
    %61 = vector.broadcast %cst_25 : f32 to vector<1x32xf32>
    %62 = arith.maximumf %60, %61 : vector<1x32xf32>
    %63 = vector.broadcast %53 : vector<1x32xf32> to vector<16x32xf32>
    %64 = arith.subf %46, %63 : vector<16x32xf32>
    %cst_26 = arith.constant 9.99999974E-6 : f32
    %65 = vector.broadcast %cst_26 : f32 to vector<1x32xf32>
    %66 = arith.addf %62, %65 : vector<1x32xf32>
    %67 = math.rsqrt %66 : vector<1x32xf32>
    %68 = vector.broadcast %67 : vector<1x32xf32> to vector<16x32xf32>
    %69 = arith.mulf %64, %68 : vector<16x32xf32>
    %70 = vector.broadcast %47 : vector<1x32xf32> to vector<16x32xf32>
    %71 = arith.mulf %69, %70 : vector<16x32xf32>
    %72 = vector.broadcast %48 : vector<1x32xf32> to vector<16x32xf32>
    %73 = arith.addf %71, %72 : vector<16x32xf32>
    %cst_27 = arith.constant 0.000000e+00 : f32
    %74 = vector.broadcast %cst_27 : f32 to vector<16x32xf32>
    %75 = arith.maximumf %73, %74 : vector<16x32xf32>
    %c136 = arith.constant 136 : index
    %c0_28 = arith.constant 0 : index
    %76 = vector.load %arg5[%c136, %c0_28] : memref<480x128xf32, #tpu.memory_space<vmem>>, vector<32x32xf32>
    %77 = arith.truncf %75 : vector<16x32xf32> to vector<16x32xbf16>
    %78 = arith.truncf %76 : vector<32x32xf32> to vector<32x32xbf16>
    %cst_29 = arith.constant dense<0.000000e+00> : vector<16x32xf32>
    %79 = tpu.matmul %77, %78, %cst_29 {dimension_numbers = #tpu.dot_dimension_numbers<[1], [0], [0], [1], [0, 0, 1, 1], [], []>} : vector<16x32xbf16>, vector<32x32xbf16>, vector<16x32xf32> -> vector<16x32xf32>
    %c168 = arith.constant 168 : index
    %c0_30 = arith.constant 0 : index
    %80 = vector.load %arg5[%c168, %c0_30] : memref<480x128xf32, #tpu.memory_space<vmem>>, vector<1x32xf32>
    %81 = vector.broadcast %80 : vector<1x32xf32> to vector<16x32xf32>
    %82 = arith.addf %79, %81 : vector<16x32xf32>
    %c176 = arith.constant 176 : index
    %c0_31 = arith.constant 0 : index
    %83 = vector.load %arg5[%c176, %c0_31] : memref<480x128xf32, #tpu.memory_space<vmem>>, vector<1x32xf32>
    %c184 = arith.constant 184 : index
    %c0_32 = arith.constant 0 : index
    %84 = vector.load %arg5[%c184, %c0_32] : memref<480x128xf32, #tpu.memory_space<vmem>>, vector<1x32xf32>
    %85 = arith.mulf %82, %4 : vector<16x32xf32>
    %cst_33 = arith.constant dense<0.000000e+00> : vector<32xf32>
    %86 = vector.multi_reduction <add>, %85, %cst_33 [0] : vector<16x32xf32> to vector<32xf32>
    %87 = vector.shape_cast %86 : vector<32xf32> to vector<1x32xf32>
    %cst_34 = arith.constant 0.0833333358 : f32
    %88 = vector.broadcast %cst_34 : f32 to vector<1x32xf32>
    %89 = arith.mulf %87, %88 : vector<1x32xf32>
    %90 = arith.mulf %85, %82 : vector<16x32xf32>
    %cst_35 = arith.constant dense<0.000000e+00> : vector<32xf32>
    %91 = vector.multi_reduction <add>, %90, %cst_35 [0] : vector<16x32xf32> to vector<32xf32>
    %92 = vector.shape_cast %91 : vector<32xf32> to vector<1x32xf32>
    %cst_36 = arith.constant 0.0833333358 : f32
    %93 = vector.broadcast %cst_36 : f32 to vector<1x32xf32>
    %94 = arith.mulf %92, %93 : vector<1x32xf32>
    %95 = arith.mulf %89, %89 : vector<1x32xf32>
    %96 = arith.subf %94, %95 : vector<1x32xf32>
    %cst_37 = arith.constant 0.000000e+00 : f32
    %97 = vector.broadcast %cst_37 : f32 to vector<1x32xf32>
    %98 = arith.maximumf %96, %97 : vector<1x32xf32>
    %99 = vector.broadcast %89 : vector<1x32xf32> to vector<16x32xf32>
    %100 = arith.subf %82, %99 : vector<16x32xf32>
    %cst_38 = arith.constant 9.99999974E-6 : f32
    %101 = vector.broadcast %cst_38 : f32 to vector<1x32xf32>
    %102 = arith.addf %98, %101 : vector<1x32xf32>
    %103 = math.rsqrt %102 : vector<1x32xf32>
    %104 = vector.broadcast %103 : vector<1x32xf32> to vector<16x32xf32>
    %105 = arith.mulf %100, %104 : vector<16x32xf32>
    %106 = vector.broadcast %83 : vector<1x32xf32> to vector<16x32xf32>
    %107 = arith.mulf %105, %106 : vector<16x32xf32>
    %108 = vector.broadcast %84 : vector<1x32xf32> to vector<16x32xf32>
    %109 = arith.addf %107, %108 : vector<16x32xf32>
    %cst_39 = arith.constant 0.000000e+00 : f32
    %110 = vector.broadcast %cst_39 : f32 to vector<16x32xf32>
    %111 = arith.maximumf %109, %110 : vector<16x32xf32>
    %c2 = arith.constant 2 : index
    %112 = memref.load %arg0[%c2] : memref<4xf32, #tpu.memory_space<smem>>
    %cst_40 = arith.constant 1.000000e+00 : f32
    %113 = arith.addf %cst_40, %112 : f32
    %114 = vector.broadcast %113 : f32 to vector<16x32xf32>
    %115 = arith.mulf %114, %111 : vector<16x32xf32>
    %116 = arith.truncf %111 : vector<16x32xf32> to vector<16x32xbf16>
    %cst_41 = arith.constant dense<0.000000e+00> : vector<16x32xf32>
    %117 = tpu.matmul %6, %116, %cst_41 {dimension_numbers = #tpu.dot_dimension_numbers<[1], [0], [0], [1], [0, 0, 1, 1], [], []>} : vector<16x16xbf16>, vector<16x32xbf16>, vector<16x32xf32> -> vector<16x32xf32>
    %118 = arith.addf %115, %117 : vector<16x32xf32>
    %c192 = arith.constant 192 : index
    %c0_42 = arith.constant 0 : index
    %119 = vector.load %arg5[%c192, %c0_42] : memref<480x128xf32, #tpu.memory_space<vmem>>, vector<32x32xf32>
    %120 = arith.truncf %118 : vector<16x32xf32> to vector<16x32xbf16>
    %121 = arith.truncf %119 : vector<32x32xf32> to vector<32x32xbf16>
    %cst_43 = arith.constant dense<0.000000e+00> : vector<16x32xf32>
    %122 = tpu.matmul %120, %121, %cst_43 {dimension_numbers = #tpu.dot_dimension_numbers<[1], [0], [0], [1], [0, 0, 1, 1], [], []>} : vector<16x32xbf16>, vector<32x32xbf16>, vector<16x32xf32> -> vector<16x32xf32>
    %c224 = arith.constant 224 : index
    %c0_44 = arith.constant 0 : index
    %123 = vector.load %arg5[%c224, %c0_44] : memref<480x128xf32, #tpu.memory_space<vmem>>, vector<1x32xf32>
    %124 = vector.broadcast %123 : vector<1x32xf32> to vector<16x32xf32>
    %125 = arith.addf %122, %124 : vector<16x32xf32>
    %c232 = arith.constant 232 : index
    %c0_45 = arith.constant 0 : index
    %126 = vector.load %arg5[%c232, %c0_45] : memref<480x128xf32, #tpu.memory_space<vmem>>, vector<1x32xf32>
    %c240 = arith.constant 240 : index
    %c0_46 = arith.constant 0 : index
    %127 = vector.load %arg5[%c240, %c0_46] : memref<480x128xf32, #tpu.memory_space<vmem>>, vector<1x32xf32>
    %128 = arith.mulf %125, %4 : vector<16x32xf32>
    %cst_47 = arith.constant dense<0.000000e+00> : vector<32xf32>
    %129 = vector.multi_reduction <add>, %128, %cst_47 [0] : vector<16x32xf32> to vector<32xf32>
    %130 = vector.shape_cast %129 : vector<32xf32> to vector<1x32xf32>
    %cst_48 = arith.constant 0.0833333358 : f32
    %131 = vector.broadcast %cst_48 : f32 to vector<1x32xf32>
    %132 = arith.mulf %130, %131 : vector<1x32xf32>
    %133 = arith.mulf %128, %125 : vector<16x32xf32>
    %cst_49 = arith.constant dense<0.000000e+00> : vector<32xf32>
    %134 = vector.multi_reduction <add>, %133, %cst_49 [0] : vector<16x32xf32> to vector<32xf32>
    %135 = vector.shape_cast %134 : vector<32xf32> to vector<1x32xf32>
    %cst_50 = arith.constant 0.0833333358 : f32
    %136 = vector.broadcast %cst_50 : f32 to vector<1x32xf32>
    %137 = arith.mulf %135, %136 : vector<1x32xf32>
    %138 = arith.mulf %132, %132 : vector<1x32xf32>
    %139 = arith.subf %137, %138 : vector<1x32xf32>
    %cst_51 = arith.constant 0.000000e+00 : f32
    %140 = vector.broadcast %cst_51 : f32 to vector<1x32xf32>
    %141 = arith.maximumf %139, %140 : vector<1x32xf32>
    %142 = vector.broadcast %132 : vector<1x32xf32> to vector<16x32xf32>
    %143 = arith.subf %125, %142 : vector<16x32xf32>
    %cst_52 = arith.constant 9.99999974E-6 : f32
    %144 = vector.broadcast %cst_52 : f32 to vector<1x32xf32>
    %145 = arith.addf %141, %144 : vector<1x32xf32>
    %146 = math.rsqrt %145 : vector<1x32xf32>
    %147 = vector.broadcast %146 : vector<1x32xf32> to vector<16x32xf32>
    %148 = arith.mulf %143, %147 : vector<16x32xf32>
    %149 = vector.broadcast %126 : vector<1x32xf32> to vector<16x32xf32>
    %150 = arith.mulf %148, %149 : vector<16x32xf32>
    %151 = vector.broadcast %127 : vector<1x32xf32> to vector<16x32xf32>
    %152 = arith.addf %150, %151 : vector<16x32xf32>
    %cst_53 = arith.constant 0.000000e+00 : f32
    %153 = vector.broadcast %cst_53 : f32 to vector<16x32xf32>
    %154 = arith.maximumf %152, %153 : vector<16x32xf32>
    %c248 = arith.constant 248 : index
    %c0_54 = arith.constant 0 : index
    %155 = vector.load %arg5[%c248, %c0_54] : memref<480x128xf32, #tpu.memory_space<vmem>>, vector<32x32xf32>
    %156 = arith.truncf %154 : vector<16x32xf32> to vector<16x32xbf16>
    %157 = arith.truncf %155 : vector<32x32xf32> to vector<32x32xbf16>
    %cst_55 = arith.constant dense<0.000000e+00> : vector<16x32xf32>
    %158 = tpu.matmul %156, %157, %cst_55 {dimension_numbers = #tpu.dot_dimension_numbers<[1], [0], [0], [1], [0, 0, 1, 1], [], []>} : vector<16x32xbf16>, vector<32x32xbf16>, vector<16x32xf32> -> vector<16x32xf32>
    %c280 = arith.constant 280 : index
    %c0_56 = arith.constant 0 : index
    %159 = vector.load %arg5[%c280, %c0_56] : memref<480x128xf32, #tpu.memory_space<vmem>>, vector<1x32xf32>
    %160 = vector.broadcast %159 : vector<1x32xf32> to vector<16x32xf32>
    %161 = arith.addf %158, %160 : vector<16x32xf32>
    %c288 = arith.constant 288 : index
    %c0_57 = arith.constant 0 : index
    %162 = vector.load %arg5[%c288, %c0_57] : memref<480x128xf32, #tpu.memory_space<vmem>>, vector<1x32xf32>
    %c296 = arith.constant 296 : index
    %c0_58 = arith.constant 0 : index
    %163 = vector.load %arg5[%c296, %c0_58] : memref<480x128xf32, #tpu.memory_space<vmem>>, vector<1x32xf32>
    %164 = arith.mulf %161, %4 : vector<16x32xf32>
    %cst_59 = arith.constant dense<0.000000e+00> : vector<32xf32>
    %165 = vector.multi_reduction <add>, %164, %cst_59 [0] : vector<16x32xf32> to vector<32xf32>
    %166 = vector.shape_cast %165 : vector<32xf32> to vector<1x32xf32>
    %cst_60 = arith.constant 0.0833333358 : f32
    %167 = vector.broadcast %cst_60 : f32 to vector<1x32xf32>
    %168 = arith.mulf %166, %167 : vector<1x32xf32>
    %169 = arith.mulf %164, %161 : vector<16x32xf32>
    %cst_61 = arith.constant dense<0.000000e+00> : vector<32xf32>
    %170 = vector.multi_reduction <add>, %169, %cst_61 [0] : vector<16x32xf32> to vector<32xf32>
    %171 = vector.shape_cast %170 : vector<32xf32> to vector<1x32xf32>
    %cst_62 = arith.constant 0.0833333358 : f32
    %172 = vector.broadcast %cst_62 : f32 to vector<1x32xf32>
    %173 = arith.mulf %171, %172 : vector<1x32xf32>
    %174 = arith.mulf %168, %168 : vector<1x32xf32>
    %175 = arith.subf %173, %174 : vector<1x32xf32>
    %cst_63 = arith.constant 0.000000e+00 : f32
    %176 = vector.broadcast %cst_63 : f32 to vector<1x32xf32>
    %177 = arith.maximumf %175, %176 : vector<1x32xf32>
    %178 = vector.broadcast %168 : vector<1x32xf32> to vector<16x32xf32>
    %179 = arith.subf %161, %178 : vector<16x32xf32>
    %cst_64 = arith.constant 9.99999974E-6 : f32
    %180 = vector.broadcast %cst_64 : f32 to vector<1x32xf32>
    %181 = arith.addf %177, %180 : vector<1x32xf32>
    %182 = math.rsqrt %181 : vector<1x32xf32>
    %183 = vector.broadcast %182 : vector<1x32xf32> to vector<16x32xf32>
    %184 = arith.mulf %179, %183 : vector<16x32xf32>
    %185 = vector.broadcast %162 : vector<1x32xf32> to vector<16x32xf32>
    %186 = arith.mulf %184, %185 : vector<16x32xf32>
    %187 = vector.broadcast %163 : vector<1x32xf32> to vector<16x32xf32>
    %188 = arith.addf %186, %187 : vector<16x32xf32>
    %cst_65 = arith.constant 0.000000e+00 : f32
    %189 = vector.broadcast %cst_65 : f32 to vector<16x32xf32>
    %190 = arith.maximumf %188, %189 : vector<16x32xf32>
    %c400 = arith.constant 400 : index
    %c0_66 = arith.constant 0 : index
    %191 = vector.load %arg5[%c400, %c0_66] : memref<480x128xf32, #tpu.memory_space<vmem>>, vector<1x32xf32>
    %c304 = arith.constant 304 : index
    %c0_67 = arith.constant 0 : index
    %192 = vector.load %arg5[%c304, %c0_67] : memref<480x128xf32, #tpu.memory_space<vmem>>, vector<32x32xf32>
    %193 = arith.truncf %32 : vector<16x32xf32> to vector<16x32xbf16>
    %194 = arith.truncf %192 : vector<32x32xf32> to vector<32x32xbf16>
    %cst_68 = arith.constant dense<0.000000e+00> : vector<16x32xf32>
    %195 = tpu.matmul %193, %194, %cst_68 {dimension_numbers = #tpu.dot_dimension_numbers<[1], [0], [0], [1], [0, 0, 1, 1], [], []>} : vector<16x32xbf16>, vector<32x32xbf16>, vector<16x32xf32> -> vector<16x32xf32>
    %196 = vector.broadcast %191 : vector<1x32xf32> to vector<16x32xf32>
    %197 = arith.addf %196, %195 : vector<16x32xf32>
    %c336 = arith.constant 336 : index
    %c0_69 = arith.constant 0 : index
    %198 = vector.load %arg5[%c336, %c0_69] : memref<480x128xf32, #tpu.memory_space<vmem>>, vector<32x32xf32>
    %199 = arith.truncf %111 : vector<16x32xf32> to vector<16x32xbf16>
    %200 = arith.truncf %198 : vector<32x32xf32> to vector<32x32xbf16>
    %cst_70 = arith.constant dense<0.000000e+00> : vector<16x32xf32>
    %201 = tpu.matmul %199, %200, %cst_70 {dimension_numbers = #tpu.dot_dimension_numbers<[1], [0], [0], [1], [0, 0, 1, 1], [], []>} : vector<16x32xbf16>, vector<32x32xbf16>, vector<16x32xf32> -> vector<16x32xf32>
    %202 = arith.addf %197, %201 : vector<16x32xf32>
    %c368 = arith.constant 368 : index
    %c0_71 = arith.constant 0 : index
    %203 = vector.load %arg5[%c368, %c0_71] : memref<480x128xf32, #tpu.memory_space<vmem>>, vector<32x32xf32>
    %204 = arith.truncf %190 : vector<16x32xf32> to vector<16x32xbf16>
    %205 = arith.truncf %203 : vector<32x32xf32> to vector<32x32xbf16>
    %cst_72 = arith.constant dense<0.000000e+00> : vector<16x32xf32>
    %206 = tpu.matmul %204, %205, %cst_72 {dimension_numbers = #tpu.dot_dimension_numbers<[1], [0], [0], [1], [0, 0, 1, 1], [], []>} : vector<16x32xbf16>, vector<32x32xbf16>, vector<16x32xf32> -> vector<16x32xf32>
    %207 = arith.addf %202, %206 : vector<16x32xf32>
    %cst_73 = arith.constant 0.000000e+00 : f32
    %208 = vector.broadcast %cst_73 : f32 to vector<16x32xf32>
    %209 = arith.maximumf %207, %208 : vector<16x32xf32>
    %c0_74 = arith.constant 0 : index
    %c0_75 = arith.constant 0 : index
    %210 = vector.load %arg3[%c0_74, %c0_75] : memref<8x16xbf16, #tpu.memory_space<vmem>>, vector<8x16xbf16>
    %211 = arith.extf %210 : vector<8x16xbf16> to vector<8x16xf32>
    %c0_76 = arith.constant 0 : index
    %c0_77 = arith.constant 0 : index
    %212 = vector.load %arg4[%c0_76, %c0_77] : memref<16x8xbf16, #tpu.memory_space<vmem>>, vector<16x8xbf16>
    %213 = arith.extf %212 : vector<16x8xbf16> to vector<16x8xf32>
    %c408 = arith.constant 408 : index
    %c0_78 = arith.constant 0 : index
    %214 = vector.load %arg5[%c408, %c0_78] : memref<480x128xf32, #tpu.memory_space<vmem>>, vector<32x1xf32>
    %cst_79 = arith.constant dense<0.000000e+00> : vector<16x1xf32>
    %215 = tpu.matmul %209, %214, %cst_79 {dimension_numbers = #tpu.dot_dimension_numbers<[1], [0], [0], [1], [0, 0, 1, 1], [], []>} : vector<16x32xf32>, vector<32x1xf32>, vector<16x1xf32> -> vector<16x1xf32>
    %c3 = arith.constant 3 : index
    %216 = memref.load %arg0[%c3] : memref<4xf32, #tpu.memory_space<smem>>
    %217 = vector.broadcast %216 : f32 to vector<16x1xf32>
    %218 = arith.addf %215, %217 : vector<16x1xf32>
    %cst_80 = arith.constant 0.000000e+00 : f32
    %219 = vector.broadcast %cst_80 : f32 to vector<16x8xf32>
    %220 = arith.cmpf ogt, %213, %219 : vector<16x8xf32>
    %cst_81 = arith.constant -1.000000e+30 : f32
    %221 = vector.shape_cast %218 : vector<16x1xf32> to vector<16x1xf32>
    %222 = vector.broadcast %221 : vector<16x1xf32> to vector<16x8xf32>
    %223 = vector.broadcast %cst_81 : f32 to vector<16x8xf32>
    %224 = arith.select %220, %222, %223 : vector<16x8xi1>, vector<16x8xf32>
    %cst_82 = arith.constant dense<0xFF800000> : vector<8xf32>
    %225 = vector.multi_reduction <maximumf>, %224, %cst_82 [0] : vector<16x8xf32> to vector<8xf32>
    %226 = vector.shape_cast %225 : vector<8xf32> to vector<1x8xf32>
    %227 = vector.broadcast %226 : vector<1x8xf32> to vector<16x8xf32>
    %228 = arith.mulf %213, %227 : vector<16x8xf32>
    %cst_83 = arith.constant dense<0.000000e+00> : vector<16xf32>
    %229 = vector.multi_reduction <add>, %228, %cst_83 [1] : vector<16x8xf32> to vector<16xf32>
    %230 = vector.shape_cast %229 : vector<16xf32> to vector<16x1xf32>
    %cst_84 = arith.constant 0.000000e+00 : f32
    %231 = vector.broadcast %cst_84 : f32 to vector<16x1xf32>
    %232 = arith.cmpf ogt, %5, %231 : vector<16x1xf32>
    %233 = arith.subf %218, %230 : vector<16x1xf32>
    %cst_85 = arith.constant -1.000000e+30 : f32
    %234 = vector.broadcast %cst_85 : f32 to vector<16x1xf32>
    %235 = arith.select %232, %233, %234 : vector<16x1xi1>, vector<16x1xf32>
    %236 = math.exp %235 : vector<16x1xf32>
    %cst_86 = arith.constant dense<0.000000e+00> : vector<8x1xf32>
    %237 = tpu.matmul %211, %236, %cst_86 {dimension_numbers = #tpu.dot_dimension_numbers<[1], [0], [0], [1], [0, 0, 1, 1], [], []>} : vector<8x16xf32>, vector<16x1xf32>, vector<8x1xf32> -> vector<8x1xf32>
    %cst_87 = arith.constant 1.000000e-30 : f32
    %238 = vector.broadcast %cst_87 : f32 to vector<8x1xf32>
    %239 = arith.maximumf %237, %238 : vector<8x1xf32>
    %240 = vector.broadcast %236 : vector<16x1xf32> to vector<16x32xf32>
    %241 = arith.mulf %240, %209 : vector<16x32xf32>
    %cst_88 = arith.constant dense<0.000000e+00> : vector<8x32xf32>
    %242 = tpu.matmul %211, %241, %cst_88 {dimension_numbers = #tpu.dot_dimension_numbers<[1], [0], [0], [1], [0, 0, 1, 1], [], []>} : vector<8x16xf32>, vector<16x32xf32>, vector<8x32xf32> -> vector<8x32xf32>
    %243 = vector.broadcast %239 : vector<8x1xf32> to vector<8x32xf32>
    %244 = arith.divf %242, %243 : vector<8x32xf32>
    %c440 = arith.constant 440 : index
    %c0_89 = arith.constant 0 : index
    %245 = vector.load %arg5[%c440, %c0_89] : memref<480x128xf32, #tpu.memory_space<vmem>>, vector<32x128xf32>
    %246 = arith.truncf %244 : vector<8x32xf32> to vector<8x32xbf16>
    %247 = arith.truncf %245 : vector<32x128xf32> to vector<32x128xbf16>
    %cst_90 = arith.constant dense<0.000000e+00> : vector<8x128xf32>
    %248 = tpu.matmul %246, %247, %cst_90 {dimension_numbers = #tpu.dot_dimension_numbers<[1], [0], [0], [1], [0, 0, 1, 1], [], []>} : vector<8x32xbf16>, vector<32x128xbf16>, vector<8x128xf32> -> vector<8x128xf32>
    %c472 = arith.constant 472 : index
    %c0_91 = arith.constant 0 : index
    %249 = vector.load %arg5[%c472, %c0_91] : memref<480x128xf32, #tpu.memory_space<vmem>>, vector<1x128xf32>
    %250 = vector.broadcast %249 : vector<1x128xf32> to vector<8x128xf32>
    %251 = arith.addf %248, %250 : vector<8x128xf32>
    %cst_92 = arith.constant 0.000000e+00 : f32
    %252 = vector.broadcast %cst_92 : f32 to vector<8x128xf32>
    %253 = arith.maximumf %251, %252 : vector<8x128xf32>
    %c0_93 = arith.constant 0 : index
    %c0_94 = arith.constant 0 : index
    %254 = vector.load %arg6[%c0_93, %c0_94] : memref<8x128xf32, #tpu.memory_space<vmem>>, vector<8x128xf32>
    tpu.vector_store %arg6[%c0_93, %c0_94], %253 {strides = array<i32>} : memref<8x128xf32, #tpu.memory_space<vmem>>, vector<8x128xf32>,
    return
  }
}

</mosaic_0001>

<bundles_post_ra>
// kernel: forward.1
= control target key start
LH: loop header
LB: loop body
LE: loop exit
PB: predicated region body
PF: predicated region fallthrough
CT: control target
= control target key end

     0   :  { %11 = vsyncpa [#allocation4], 0  ;;  %s1752_s0 = inlined_call_operand.vmem [shape: f32[4], index: 0, kind: input, shape index: {}]   ;;  %s1753_s1 = inlined_call_operand.vmem [shape: bf16[16,16], index: 1, kind: input, shape index: {}]   ;;  %s1754_s2 = inlined_call_operand.vmem [shape: f32[16,32], index: 2, kind: input, shape index: {}]   ;;  %s1755_s3 = inlined_call_operand.vmem [shape: bf16[8,16], index: 3, kind: input, shape index: {}]   ;;  %s1756_s4 = inlined_call_operand.vmem [shape: bf16[16,8], index: 4, kind: input, shape index: {}]   ;;  %s1757_s5 = inlined_call_operand.hbm [shape: f32[480,128], index: 5, kind: input, shape index: {}]   ;;  %s1758_s6 = inlined_call_operand.vmem [shape: f32[8,128], index: 6, kind: output, shape index: {}]  }
   0x1   :  { %s19_s23 = sshll.u32 %s1752_s0, 4  ;;  %s20_s23 = int_to_ptr.vmem [resolvable:$true] %s19_s23 }
   0x2   :  { %12 = vsyncpa [#allocation3], 0  ;;  %s1519_s24 = scalar_lea.vmem %s20_s23, 16  ;;  %p1524_p1 = scmp.lt.s32.totalorder %s20_s23, %s20_s23 }
   0x3   :  { %p1520_p0 = scmp.ne.s32.totalorder %s20_s23, %s1519_s24  ;;  %p1525_p2 = scmp.lt.s32.totalorder %s1519_s24, %s1519_s24 }
   0x5   :  { %p1526_p3 = por %p1525_p2, %p1524_p1 }
   0x7   :  { %p1527_p4 = pnand %p1526_p3, %p1520_p0 }
   0x9   :  { %1530 = shalt.err (!%p1527_p4)
}
   0xa   :  { %s1555_s25 = smov [#allocation2]   ;;  %s1556_s26 = smov [#allocation5]  }
   0xb   :  { %22 = dma.vmem_to_smem %s20_s23, 16, %s1555_s25, [#allocation4]  }
   0xc   :  { %s36_s27 = sshll.u32 %s1556_s26, 4  ;;  %s37_s27 = int_to_ptr.vmem [resolvable:$true] %s36_s27 }
   0xd   :  { %s1539_s28 = scalar_lea.vmem %s37_s27, 7680  ;;  %p1544_p6 = scmp.lt.s32.totalorder %s37_s27, %s37_s27 }
   0xe   :  { %p1540_p5 = scmp.ne.s32.totalorder %s37_s27, %s1539_s28  ;;  %p1545_p7 = scmp.lt.s32.totalorder %s1539_s28, %s1539_s28 }
  0x10   :  { %p1546_p8 = por %p1545_p7, %p1544_p6 }
  0x12   :  { %p1547_p9 = pnand %p1546_p8, %p1540_p5 }
  0x14   :  { %1550 = shalt.err (!%p1547_p9)
}
  0x15   :  { %s1557_s0 = smov 128   ;;  %s1558_s29 = smov 8  }
  0x16   :  { %42 = dma.hbm_to_vmem [thread:$0]  %s1757_s5, 7680, %s37_s27, [#allocation3], %s1557_s0, %s1557_s0, %s1558_s29  }
  0x17   :  { %1551 = dma.done.wait [#allocation4], 16  }
  0x18   :  { %1552 = vsyncadd [#allocation4], 4294967280 }
  0x19   :  { %1553 = dma.done.wait [#allocation3], 7680  }
  0x1a   :  { %1554 = vsyncadd [#allocation3], 4294959616 }
  0x1b   :  { %49 = sfence }
  0x1c   :  { %v62_v0 = vld [vmem:[%s1754_s2] sm:$0xff]  ;;  %v63_v1 = vld [vmem:[%s1754_s2 + $0x8] sm:$0xff]  ;;  %v1559_v2 = vmov 0.0   ;;  %vm1560_vm0 = vmmov 0   ;;  %vm75_vm1 = vcmask 130048   ;;  %v124_v5 = vld [vmem:[#allocation5 + $0x10] sm:$0xff] }
  0x1d   :  { %1372 = vmatprep.subr.bf16.mxu1 %v1559_v2  ;;  %v69_v3 = vpack.c.bf16 %v63_v1, %v62_v0  ;;  %1374 = vmatprep.mubr.msk.bf16.mxu1 %vm1560_vm0, %v1559_v2  ;;  %v1615_v4 = vld [vmem:[%s1753_s1] sm:$0xff]   ;;  %v125_v6 = vld [vmem:[#allocation5 + $0x18] sm:$0xff]  ;;  %v123_v9 = vld [vmem:[#allocation5 + $0x8] sm:$0xff]  ;;  %s64_s1 = sld [smem:[#allocation2]]  ;;  %vm134_vm2 = vcmask 261120   ;;  %vm1028_vm6 = vcmask 64512  }
  0x1e   :  { %1386 = vmatprep.subr.bf16.mxu0 %v1559_v2  ;;  %1390 = vmatprep.mubr.msk.bf16.mxu0 %vm1560_vm0, %v1559_v2  ;;  %v128_v7 = vpack.c.bf16 %v125_v6, %v124_v5  ;;  %v122_v8 = vld [vmem:[#allocation5] sm:$0xff]  ;;  %v183_v21 = vld [vmem:[#allocation5 + $0x38] sm:$0xff]  ;;  %v181_v24 = vld [vmem:[#allocation5 + $0x28] sm:$0xff]  ;;  %s1289_s13 = sld [smem:[#allocation2 + $0x1]] }
  0x1f   :  { %1373 = vmatpush3.bf16.msra.mxu1 %v69_v3  ;;  %v127_v10 = vpack.c.bf16 %v123_v9, %v122_v8  ;;  %v184_v22 = vld [vmem:[#allocation5 + $0x40] sm:$0xff]  ;;  %v182_v25 = vld [vmem:[#allocation5 + $0x30] sm:$0xff]  ;;  %v1287_v37 = vld [vmem:[#allocation5 + $0x48] ss:$0 sm:$0xff]  ;;  %s1299_s15 = sld [smem:[#allocation2 + $0x2]] }
  0x20   :  { %1378 = vmatprep.subr.bf16.mxu1 %v1559_v2  ;;  %v187_v23 = vpack.c.bf16 %v184_v22, %v183_v21  ;;  %v186_v26 = vpack.c.bf16 %v182_v25, %v181_v24  ;;  %v1285_v27 = vld [vmem:[#allocation5 + $0x20] ss:$0 sm:$0xff]  ;;  %v291_v48 = vld [vmem:[#allocation5 + $0x68] sm:$0xff]  ;;  %v288_v50 = vld [vmem:[#allocation5 + $0x50] sm:$0xff]  ;;  %s1313_s17 = sld [smem:[#allocation2 + $0x3]] }
  0x21   :  { %v290_v47 = vld [vmem:[#allocation5 + $0x60] sm:$0xff]  ;;  %v289_v51 = vld [vmem:[#allocation5 + $0x58] sm:$0xff]  ;;  %v393_v3 = vld [vmem:[#allocation5 + $0x88] sm:$0xff] }
  0x22   :  { %1375 = vmatmul.mubr.msk.bf16.vlgmr.msra.gmra.mxu1 %vm75_vm1, %v1615_v4  ;;  %1387 = vmatpush3.bf16.msra.mxu0 %v187_v23  ;;  %v294_v49 = vpack.c.bf16 %v291_v48, %v290_v47  ;;  %v293_v52 = vpack.c.bf16 %v289_v51, %v288_v50  ;;  %v395_v63 = vld [vmem:[#allocation5 + $0x98] sm:$0xff]  ;;  %v394_v5 = vld [vmem:[#allocation5 + $0x90] sm:$0xff] }
  0x23   :  { %1382 = vmatprep.mubr.msk.bf16.mxu1 %vm1560_vm0, %v1559_v2  ;;  %1379 = vmatpush3.bf16.msra.mxu1 %v128_v7  ;;  %s65_s2 = sadd.f32 1.0, %s64_s1  ;;  %v398_v6 = vpack.c.bf16 %v394_v5, %v393_v3  ;;  %v51_v7 = vlaneseq }
  0x24   :  { %1380 = vmatprep.subr.bf16.mxu1 %v1559_v2  ;;  %1388 = vmatprep.subr.bf16.mxu0 %v1559_v2  ;;  %s240_s14 = sadd.f32 1.0, %s1289_s13 }
  0x25   :  { %v66_v11 = vstv %s65_s2  ;;  %v52_v8 = vshrl.u32 %v51_v7, 7  ;;  %s499_s16 = sadd.f32 1.0, %s1299_s15 }
  0x26   :  { %v67_v13 = vmul.f32 %v66_v11, %v62_v0  ;;  %v68_v14 = vmul.f32 %v66_v11, %v63_v1  ;;  %1389 = vmatpush3.bf16.msra.mxu0 %v186_v26  ;;  %v241_v53 = vstv %s240_s14  ;;  %v396_v0 = vld [vmem:[#allocation5 + $0xa0] sm:$0xff] }
  0x27   :  { %1381 = vmatpush3.bf16.msra.mxu1 %v127_v10  ;;  %1400 = vmatprep.subr.bf16.mxu0 %v1559_v2  ;;  %v399_v1 = vpack.c.bf16 %v396_v0, %v395_v63  ;;  %v53_v9 = vadd.s32 8, %v52_v8  ;;  %v1291_v10 = vld [vmem:[#allocation5 + $0x70] ss:$0 sm:$0xff] }
  0x28   :  { %1394 = vmatprep.subr.bf16.mxu1 %v1559_v2 }
  0x29   :  { %vm55_vm3 = vcmp.lt.s32.totalorder %v53_v9, 12 }
  0xe2   :  { %v113_v12 = vpop.f32.mrf.mxu1 }
  0xe3   :  { %v120_v17 = vadd.f32 %v113_v12, %v67_v13 }
  0xe4   :  { %v1376_v15 = vpop.f32.mrf.mxu1 }
  0xe6   :  { %v116_v16 = vpop.f32.mrf.mxu1 }
  0xe7   :  { %v121_v18 = vadd.f32 %v116_v16, %v68_v14  ;;  %v1651_v14 = vsel %vm55_vm3, 1.0, %v1559_v2 }
  0xe8   :  { %v1377_v19 = vpop.f32.mrf.mxu1  ;;  %vm1047_vm7 = vcmp.gt.f32.partialorder %v1651_v14, 0.0 }
  0xe9   :  { %v126_v20 = vpack.c.bf16 %v121_v18, %v120_v17 }
  0xeb   :  { %1383 = vmatmul.mubr.msk.bf16.vlgmr.msra.gmra.mxu1 %vm134_vm2, %v126_v20 }
  0xec   :  { %1396 = vmatprep.mubr.msk.bf16.mxu1 %vm1560_vm0, %v1559_v2 }
 0x1ab   :  { %v172_v28 = vpop.f32.mrf.mxu1 }
 0x1ac   :  { %v173_v30 = vadd.f32 %v1285_v27, %v172_v28 }
 0x1ad   :  { %v1384_v29 = vpop.f32.mrf.mxu1 }
 0x1ae   :  { %v179_v34 = vmax.f32 %v173_v30, 0.0 }
 0x1af   :  { %v175_v31 = vpop.f32.mrf.mxu1 }
 0x1b0   :  { %v176_v32 = vadd.f32 %v1285_v27, %v175_v31 }
 0x1b1   :  { %v1385_v33 = vpop.f32.mrf.mxu1 }
 0x1b2   :  { %v180_v35 = vmax.f32 %v176_v32, 0.0 }
 0x1b4   :  { %v185_v36 = vpack.c.bf16 %v180_v35, %v179_v34 }
 0x1b6   :  { %1391 = vmatmul.mubr.msk.bf16.vlgmr.msra.gmra.mxu0 %vm134_vm2, %v185_v36 }
 0x1b7   :  { %1404 = vmatprep.mubr.msk.bf16.mxu0 %vm1560_vm0, %v1559_v2  ;;  %1401 = vmatpush3.bf16.msra.mxu0 %v294_v49  ;;  %v1293_v49 = vld [vmem:[#allocation5 + $0x78] ss:$0 sm:$0xff] }
 0x1b8   :  { %1402 = vmatprep.subr.bf16.mxu0 %v1559_v2 }
 0x1bb   :  { %1403 = vmatpush3.bf16.msra.mxu0 %v293_v52  ;;  %v1294_v52 = vld [vmem:[#allocation5 + $0x80] ss:$0 sm:$0xff] }
 0x1bc   :  { %1416 = vmatprep.subr.bf16.mxu0 %v1559_v2 }
 0x276   :  { %v230_v38 = vpop.f32.mrf.mxu0 }
 0x277   :  { %v231_v40 = vadd.f32 %v1287_v37, %v230_v38 }
 0x278   :  { %v1392_v39 = vpop.f32.mrf.mxu0 }
 0x279   :  { %v237_v44 = vmax.f32 %v231_v40, 0.0 }
 0x27a   :  { %v233_v41 = vpop.f32.mrf.mxu0 }
 0x27b   :  { %v234_v42 = vadd.f32 %v1287_v37, %v233_v41  ;;  %v242_v56 = vmul.f32 %v241_v53, %v237_v44 }
 0x27c   :  { %v1393_v43 = vpop.f32.mrf.mxu0 }
 0x27d   :  { %v238_v45 = vmax.f32 %v234_v42, 0.0 }
 0x27f   :  { %v1635_v46 = vpack.c.bf16 %v238_v45, %v237_v44  ;;  %v243_v57 = vmul.f32 %v241_v53, %v238_v45 }
 0x281   :  { %1395 = vmatpush3.bf16.msra.mxu1 %v1635_v46 }
 0x282   :  { %1408 = vmatprep.subr.bf16.mxu1 %v1559_v2 }
 0x284   :  { %1397 = vmatmul.mubr.msk.bf16.vlgmr.msra.gmra.mxu1 %vm75_vm1, %v1615_v4 }
 0x285   :  { %1412 = vmatprep.mubr.msk.bf16.mxu1 %vm1560_vm0, %v1559_v2  ;;  %1409 = vmatpush3.bf16.msra.mxu1 %v399_v1 }
 0x286   :  { %1410 = vmatprep.subr.bf16.mxu1 %v1559_v2 }
 0x289   :  { %1411 = vmatpush3.bf16.msra.mxu1 %v398_v6 }
 0x28a   :  { %1422 = vmatprep.subr.bf16.mxu1 %v1559_v2 }
 0x344   :  { %v279_v54 = vpop.f32.mrf.mxu1 }
 0x345   :  { %v286_v59 = vadd.f32 %v279_v54, %v242_v56 }
 0x346   :  { %v1398_v55 = vpop.f32.mrf.mxu1 }
 0x348   :  { %v282_v58 = vpop.f32.mrf.mxu1 }
 0x349   :  { %v287_v60 = vadd.f32 %v282_v58, %v243_v57 }
 0x34a   :  { %v1399_v61 = vpop.f32.mrf.mxu1 }
 0x34b   :  { %v292_v62 = vpack.c.bf16 %v287_v60, %v286_v59  ;;  %v1295_v60 = vld [vmem:[#allocation5 + $0xa8] ss:$0 sm:$0xff] }
 0x34d   :  { %1405 = vmatmul.mubr.msk.bf16.vlgmr.msra.gmra.mxu0 %vm134_vm2, %v292_v62 }
 0x34e   :  { %1418 = vmatprep.mubr.msk.bf16.mxu0 %vm1560_vm0, %v1559_v2 }
 0x40d   :  { %v337_v11 = vpop.f32.mrf.mxu0 }
 0x40e   :  { %v338_v13 = vadd.f32 %v1291_v10, %v337_v11 }
 0x40f   :  { %v1406_v12 = vpop.f32.mrf.mxu0 }
 0x410   :  { %v358_v18 = vmul.f32 %v338_v13, %v338_v13  ;;  %v348_v20 = vsel %vm134_vm2, %v338_v13, 0.0 }
 0x411   :  { %v340_v15 = vpop.f32.mrf.mxu0 }
 0x412   :  { %v341_v16 = vadd.f32 %v1291_v10, %v340_v15  ;;  %v360_v24 = vsel %vm134_vm2, %v358_v18, 0.0 }
 0x413   :  { %v1407_v17 = vpop.f32.mrf.mxu0 }
 0x414   :  { %v347_v19 = vmul.f32 %v1651_v14, %v341_v16 }
 0x416   :  { %v349_v21 = vsel %vm134_vm2, %v347_v19, 0.0  ;;  %v359_v22 = vmul.f32 %v347_v19, %v341_v16 }
 0x417   :  { %v350_v23 = vadd.f32 %v349_v21, %v348_v20 }
 0x418   :  { %v361_v25 = vsel %vm134_vm2, %v359_v22, 0.0 }
 0x419   :  { %v351_v26 = vrot.slane %v350_v23, 4  ;;  %v362_v27 = vadd.f32 %v361_v25, %v360_v24 }
 0x41b   :  { %v352_v28 = vadd.f32 %v351_v26, %v350_v23  ;;  %v363_v29 = vrot.slane %v362_v27, 4 }
 0x41d   :  { %v353_v30 = vrot.slane %v352_v28, 2  ;;  %v364_v31 = vadd.f32 %v363_v29, %v362_v27 }
 0x41f   :  { %v354_v32 = vadd.f32 %v353_v30, %v352_v28  ;;  %v365_v33 = vrot.slane %v364_v31, 2 }
 0x421   :  { %v355_v34 = vrot.slane %v354_v32, 1  ;;  %v366_v35 = vadd.f32 %v365_v33, %v364_v31 }
 0x423   :  { %v356_v36 = vadd.f32 %v355_v34, %v354_v32  ;;  %v367_v37 = vrot.slane %v366_v35, 1 }
 0x425   :  { %v357_v38 = vmul.f32 0.083333336, %v356_v36  ;;  %v368_v39 = vadd.f32 %v367_v37, %v366_v35  ;;  %v1297_v36 = vld [vmem:[#allocation5 + $0xb0] ss:$0 sm:$0xff] }
 0x427   :  { %v369_v40 = vmul.f32 0.083333336, %v368_v39  ;;  %v370_v41 = vmul.f32 %v357_v38, %v357_v38  ;;  %v373_v45 = vsub.f32 %v338_v13, %v357_v38  ;;  %v374_v47 = vsub.f32 %v341_v16, %v357_v38  ;;  %v1298_v39 = vld [vmem:[#allocation5 + $0xb8] ss:$0 sm:$0xff] }
 0x429   :  { %v371_v42 = vsub.f32 %v369_v40, %v370_v41 }
 0x42b   :  { %v372_v43 = vmax.f32 %v371_v42, 0.0 }
 0x42d   :  { %v375_v44 = vadd.f32 1e-05, %v372_v43 }
 0x42f   :  { %1505 = vrsqrt.f32 %v375_v44 }
 0x43c   :  { %v1506_v48 = vpop.eup %1505 }
 0x43d   :  { %v377_v50 = vmul.f32 %v1506_v48, %v373_v45  ;;  %v378_v51 = vmul.f32 %v1506_v48, %v374_v47  ;;  %v549_v48 = vld [vmem:[#allocation5 + $0xd0] sm:$0xff] }
 0x43f   :  { %v383_v53 = vmul.f32 %v1293_v49, %v377_v50  ;;  %v384_v54 = vmul.f32 %v1293_v49, %v378_v51  ;;  %v550_v49 = vld [vmem:[#allocation5 + $0xd8] sm:$0xff]  ;;  %v547_v51 = vld [vmem:[#allocation5 + $0xc0] sm:$0xff] }
 0x440   :  { %v553_v50 = vpack.c.bf16 %v550_v49, %v549_v48 }
 0x441   :  { %v389_v55 = vadd.f32 %v1294_v52, %v383_v53  ;;  %v390_v56 = vadd.f32 %v1294_v52, %v384_v54  ;;  %v548_v52 = vld [vmem:[#allocation5 + $0xc8] sm:$0xff]  ;;  %v500_v54 = vstv %s499_s16 }
 0x442   :  { %v552_v53 = vpack.c.bf16 %v548_v52, %v547_v51 }
 0x443   :  { %v391_v57 = vmax.f32 %v389_v55, 0.0  ;;  %v392_v58 = vmax.f32 %v390_v56, 0.0 }
 0x445   :  { %v397_v59 = vpack.c.bf16 %v392_v58, %v391_v57  ;;  %v760_v58 = vld [vmem:[#allocation5 + $0x140] sm:$0xff] }
 0x447   :  { %1413 = vmatmul.mubr.msk.bf16.vlgmr.msra.gmra.mxu1 %vm134_vm2, %v397_v59  ;;  %v761_v59 = vld [vmem:[#allocation5 + $0x148] sm:$0xff] }
 0x448   :  { %1426 = vmatprep.mubr.msk.bf16.mxu1 %vm1560_vm0, %v1559_v2  ;;  %1423 = vmatpush3.bf16.msra.mxu1 %v553_v50 }
 0x449   :  { %1424 = vmatprep.subr.bf16.mxu1 %v1559_v2 }
 0x44c   :  { %1425 = vmatpush3.bf16.msra.mxu1 %v552_v53 }
 0x44d   :  { %1438 = vmatprep.subr.bf16.mxu1 %v1559_v2 }
 0x507   :  { %v442_v61 = vpop.f32.mrf.mxu1 }
 0x508   :  { %v443_v63 = vadd.f32 %v1295_v60, %v442_v61 }
 0x509   :  { %v1414_v62 = vpop.f32.mrf.mxu1 }
 0x50a   :  { %v463_v5 = vmul.f32 %v443_v63, %v443_v63  ;;  %v453_v7 = vsel %vm134_vm2, %v443_v63, 0.0 }
 0x50b   :  { %v445_v0 = vpop.f32.mrf.mxu1 }
 0x50c   :  { %v446_v1 = vadd.f32 %v1295_v60, %v445_v0  ;;  %v465_v11 = vsel %vm134_vm2, %v463_v5, 0.0  ;;  %v763_v0 = vpack.c.bf16 %v761_v59, %v760_v58  ;;  %v759_v5 = vld [vmem:[#allocation5 + $0x138] sm:$0xff]  ;;  %v1304_v58 = vld [vmem:[#allocation5 + $0xf0] ss:$0 sm:$0xff] }
 0x50d   :  { %v1415_v3 = vpop.f32.mrf.mxu1 }
 0x50e   :  { %v452_v6 = vmul.f32 %v1651_v14, %v446_v1  ;;  %v758_v3 = vld [vmem:[#allocation5 + $0x130] sm:$0xff] }
 0x510   :  { %v454_v8 = vsel %vm134_vm2, %v452_v6, 0.0  ;;  %v464_v9 = vmul.f32 %v452_v6, %v446_v1  ;;  %v762_v6 = vpack.c.bf16 %v759_v5, %v758_v3 }
 0x511   :  { %v455_v10 = vadd.f32 %v454_v8, %v453_v7  ;;  %v654_v7 = vld [vmem:[#allocation5 + $0x108] sm:$0xff]  ;;  %v655_v8 = vld [vmem:[#allocation5 + $0x110] sm:$0xff] }
 0x512   :  { %v466_v12 = vsel %vm134_vm2, %v464_v9, 0.0  ;;  %v658_v9 = vpack.c.bf16 %v655_v8, %v654_v7  ;;  %v814_v7 = vld [vmem:[#allocation5 + $0x150] sm:$0xff]  ;;  %v815_v8 = vld [vmem:[#allocation5 + $0x158] sm:$0xff] }
 0x513   :  { %v456_v13 = vrot.slane %v455_v10, 4  ;;  %v467_v15 = vadd.f32 %v466_v12, %v465_v11  ;;  %v653_v11 = vld [vmem:[#allocation5 + $0x100] sm:$0xff] }
 0x515   :  { %v457_v16 = vadd.f32 %v456_v13, %v455_v10  ;;  %v468_v17 = vrot.slane %v467_v15, 4  ;;  %v652_v10 = vld [vmem:[#allocation5 + $0xf8] sm:$0xff]  ;;  %v1301_v13 = vld [vmem:[#allocation5 + $0xe0] ss:$0 sm:$0xff] }
 0x516   :  { %v657_v12 = vpack.c.bf16 %v653_v11, %v652_v10  ;;  %v868_v10 = vld [vmem:[#allocation5 + $0x180] sm:$0xff]  ;;  %v869_v11 = vld [vmem:[#allocation5 + $0x188] sm:$0xff] }
 0x517   :  { %v458_v18 = vrot.slane %v457_v16, 2  ;;  %v469_v19 = vadd.f32 %v468_v17, %v467_v15 }
 0x519   :  { %v459_v20 = vadd.f32 %v458_v18, %v457_v16  ;;  %v470_v21 = vrot.slane %v469_v19, 2 }
 0x51b   :  { %v460_v22 = vrot.slane %v459_v20, 1  ;;  %v471_v23 = vadd.f32 %v470_v21, %v469_v19 }
 0x51d   :  { %v461_v24 = vadd.f32 %v460_v22, %v459_v20  ;;  %v472_v25 = vrot.slane %v471_v23, 1 }
 0x51f   :  { %v462_v26 = vmul.f32 0.083333336, %v461_v24  ;;  %v473_v27 = vadd.f32 %v472_v25, %v471_v23 }
 0x521   :  { %v474_v28 = vmul.f32 0.083333336, %v473_v27  ;;  %v475_v29 = vmul.f32 %v462_v26, %v462_v26  ;;  %v478_v33 = vsub.f32 %v443_v63, %v462_v26  ;;  %v479_v34 = vsub.f32 %v446_v1, %v462_v26 }
 0x523   :  { %v476_v30 = vsub.f32 %v474_v28, %v475_v29 }
 0x525   :  { %v477_v31 = vmax.f32 %v476_v30, 0.0 }
 0x527   :  { %v480_v32 = vadd.f32 1e-05, %v477_v31 }
 0x529   :  { %1507 = vrsqrt.f32 %v480_v32 }
 0x536   :  { %v1508_v35 = vpop.eup %1507 }
 0x537   :  { %v482_v37 = vmul.f32 %v1508_v35, %v478_v33  ;;  %v483_v38 = vmul.f32 %v1508_v35, %v479_v34 }
 0x539   :  { %v488_v40 = vmul.f32 %v1297_v36, %v482_v37  ;;  %v489_v41 = vmul.f32 %v1297_v36, %v483_v38 }
 0x53b   :  { %v494_v42 = vadd.f32 %v1298_v39, %v488_v40  ;;  %v495_v43 = vadd.f32 %v1298_v39, %v489_v41 }
 0x53d   :  { %v496_v44 = vmax.f32 %v494_v42, 0.0  ;;  %v497_v45 = vmax.f32 %v495_v43, 0.0 }
 0x53f   :  { %v1666_v47 = vpack.c.bf16 %v497_v45, %v496_v44  ;;  %v501_v56 = vmul.f32 %v500_v54, %v496_v44  ;;  %v502_v57 = vmul.f32 %v500_v54, %v497_v45 }
 0x541   :  { %1417 = vmatpush3.bf16.msra.mxu0 %v1666_v47 }
 0x542   :  { %1430 = vmatprep.subr.bf16.mxu0 %v1559_v2 }
 0x544   :  { %1419 = vmatmul.mubr.msk.bf16.vlgmr.msra.gmra.mxu0 %vm75_vm1, %v1615_v4 }
 0x545   :  { %1434 = vmatprep.mubr.msk.bf16.mxu0 %vm1560_vm0, %v1559_v2  ;;  %1431 = vmatpush3.bf16.msra.mxu0 %v658_v9  ;;  %v818_v9 = vpack.c.bf16 %v815_v8, %v814_v7 }
 0x546   :  { %1432 = vmatprep.subr.bf16.mxu0 %v1559_v2 }
 0x549   :  { %1433 = vmatpush3.bf16.msra.mxu0 %v657_v12  ;;  %v872_v12 = vpack.c.bf16 %v869_v11, %v868_v10  ;;  %v930_v11 = vld [vmem:[#allocation5 + $0x1b0] sm:$0xff] }
 0x54a   :  { %1446 = vmatprep.subr.bf16.mxu0 %v1559_v2 }
 0x604   :  { %v538_v55 = vpop.f32.mrf.mxu0 }
 0x605   :  { %v545_v61 = vadd.f32 %v538_v55, %v501_v56 }
 0x606   :  { %v1420_v4 = vpop.f32.mrf.mxu0 }
 0x607   :  { %v1303_v4 = vld [vmem:[#allocation5 + $0xe8] ss:$0 sm:$0xff] }
 0x608   :  { %v541_v60 = vpop.f32.mrf.mxu0 }
 0x609   :  { %v546_v62 = vadd.f32 %v541_v60, %v502_v57 }
 0x60a   :  { %v1421_v63 = vpop.f32.mrf.mxu0 }
 0x60b   :  { %v551_v1 = vpack.c.bf16 %v546_v62, %v545_v61  ;;  %v816_v63 = vld [vmem:[#allocation5 + $0x160] sm:$0xff] }
 0x60d   :  { %1427 = vmatmul.mubr.msk.bf16.vlgmr.msra.gmra.mxu1 %vm134_vm2, %v551_v1 }
 0x60e   :  { %1439 = vmatpush3.bf16.msra.mxu1 %v763_v0  ;;  %1442 = vmatprep.mubr.msk.bf16.mxu1 %vm1560_vm0, %v1559_v2  ;;  %v817_v0 = vld [vmem:[#allocation5 + $0x168] sm:$0xff] }
 0x60f   :  { %1440 = vmatprep.subr.bf16.mxu1 %v1559_v2  ;;  %v819_v5 = vpack.c.bf16 %v817_v0, %v816_v63 }
 0x612   :  { %1441 = vmatpush3.bf16.msra.mxu1 %v762_v6 }
 0x613   :  { %1454 = vmatprep.subr.bf16.mxu1 %v1559_v2 }
 0x615   :  { %1443 = vmatmul.mubr.msk.bf16.vlgmr.msra.gmra.mxu1 %vm134_vm2, %v1635_v46 }
 0x616   :  { %1458 = vmatprep.mubr.msk.bf16.mxu1 %vm1560_vm0, %v1559_v2  ;;  %1455 = vmatpush3.bf16.msra.mxu1 %v872_v12  ;;  %v929_v12 = vld [vmem:[#allocation5 + $0x1a8] sm:$0xff] }
 0x617   :  { %1456 = vmatprep.subr.bf16.mxu1 %v1559_v2 }
 0x6cd   :  { %v596_v15 = vpop.f32.mrf.mxu1 }
 0x6ce   :  { %v597_v17 = vadd.f32 %v1301_v13, %v596_v15  ;;  %v867_v15 = vld [vmem:[#allocation5 + $0x178] sm:$0xff] }
 0x6cf   :  { %v1428_v16 = vpop.f32.mrf.mxu1 }
 0x6d0   :  { %v617_v20 = vmul.f32 %v597_v17, %v597_v17  ;;  %v607_v23 = vsel %vm134_vm2, %v597_v17, 0.0 }
 0x6d1   :  { %v599_v46 = vpop.f32.mrf.mxu1 }
 0x6d2   :  { %v600_v18 = vadd.f32 %v1301_v13, %v599_v46  ;;  %v619_v28 = vsel %vm134_vm2, %v617_v20, 0.0  ;;  %v866_v13 = vld [vmem:[#allocation5 + $0x170] sm:$0xff] }
 0x6d3   :  { %v1429_v19 = vpop.f32.mrf.mxu1  ;;  %v871_v16 = vpack.c.bf16 %v867_v15, %v866_v13  ;;  %v1310_v20 = vld [vmem:[#allocation5 + $0x190] ss:$0 sm:$0xff]  ;;  %v928_v13 = vld [vmem:[#allocation5 + $0x1a0] sm:$0xff]  ;;  %v927_v15 = vld [vmem:[#allocation5 + $0x198] sm:$0xff] }
 0x6d4   :  { %v606_v21 = vmul.f32 %v1651_v14, %v600_v18 }
 0x6d5   :  { %v1688_v22 = vpop.f32.mrf.mxu1  ;;  %1457 = vmatpush3.bf16.msra.mxu1 %v871_v16 }
 0x6d6   :  { %v608_v24 = vsel %vm134_vm2, %v606_v21, 0.0  ;;  %v618_v25 = vmul.f32 %v606_v21, %v600_v18  ;;  %1480 = vmatprep.subr.mxu1 %v1559_v2 }
 0x6d7   :  { %v609_v26 = vadd.f32 %v608_v24, %v607_v23  ;;  %v1444_v27 = vpop.f32.mrf.mxu1  ;;  %v812_v24 = vadd.f32 %v1310_v20, %v1688_v22 }
 0x6d8   :  { %v620_v29 = vsel %vm134_vm2, %v618_v25, 0.0 }
 0x6d9   :  { %v610_v30 = vrot.slane %v609_v26, 4  ;;  %v621_v31 = vadd.f32 %v620_v29, %v619_v28  ;;  %v1694_v32 = vpop.f32.mrf.mxu1 }
 0x6db   :  { %v611_v33 = vadd.f32 %v610_v30, %v609_v26  ;;  %v622_v34 = vrot.slane %v621_v31, 4  ;;  %v1445_v35 = vpop.f32.mrf.mxu1 }
 0x6dc   :  { %v813_v35 = vadd.f32 %v1310_v20, %v1694_v32 }
 0x6dd   :  { %v612_v36 = vrot.slane %v611_v33, 2  ;;  %v623_v37 = vadd.f32 %v622_v34, %v621_v31 }
 0x6df   :  { %v613_v38 = vadd.f32 %v612_v36, %v611_v33  ;;  %v624_v39 = vrot.slane %v623_v37, 2 }
 0x6e1   :  { %v614_v40 = vrot.slane %v613_v38, 1  ;;  %v625_v41 = vadd.f32 %v624_v39, %v623_v37 }
 0x6e3   :  { %v615_v42 = vadd.f32 %v614_v40, %v613_v38  ;;  %v626_v43 = vrot.slane %v625_v41, 1 }
 0x6e5   :  { %v616_v44 = vmul.f32 0.083333336, %v615_v42  ;;  %v627_v45 = vadd.f32 %v626_v43, %v625_v41 }
 0x6e7   :  { %v628_v48 = vmul.f32 0.083333336, %v627_v45  ;;  %v629_v49 = vmul.f32 %v616_v44, %v616_v44  ;;  %v632_v53 = vsub.f32 %v597_v17, %v616_v44  ;;  %v633_v54 = vsub.f32 %v600_v18, %v616_v44  ;;  %v1305_v17 = vld [vmem:[#allocation5 + $0x118] ss:$0 sm:$0xff] }
 0x6e9   :  { %v630_v50 = vsub.f32 %v628_v48, %v629_v49 }
 0x6eb   :  { %v631_v51 = vmax.f32 %v630_v50, 0.0 }
 0x6ed   :  { %v634_v52 = vadd.f32 1e-05, %v631_v51 }
 0x6ef   :  { %1509 = vrsqrt.f32 %v634_v52 }
 0x6fc   :  { %v1510_v55 = vpop.eup %1509 }
 0x6fd   :  { %v636_v56 = vmul.f32 %v1510_v55, %v632_v53  ;;  %v637_v57 = vmul.f32 %v1510_v55, %v633_v54 }
 0x6ff   :  { %v642_v59 = vmul.f32 %v1303_v4, %v636_v56  ;;  %v643_v60 = vmul.f32 %v1303_v4, %v637_v57 }
 0x701   :  { %v648_v61 = vadd.f32 %v1304_v58, %v642_v59  ;;  %v649_v62 = vadd.f32 %v1304_v58, %v643_v60 }
 0x703   :  { %v650_v1 = vmax.f32 %v648_v61, 0.0  ;;  %v651_v3 = vmax.f32 %v649_v62, 0.0  ;;  %v1307_v62 = vld [vmem:[#allocation5 + $0x120] ss:$0 sm:$0xff] }
 0x705   :  { %v656_v6 = vpack.c.bf16 %v651_v3, %v650_v1  ;;  %v1308_v1 = vld [vmem:[#allocation5 + $0x128] ss:$0 sm:$0xff] }
 0x707   :  { %1435 = vmatmul.mubr.msk.bf16.vlgmr.msra.gmra.mxu0 %vm134_vm2, %v656_v6 }
 0x708   :  { %1447 = vmatpush3.bf16.msra.mxu0 %v819_v5  ;;  %1450 = vmatprep.mubr.msk.bf16.mxu0 %vm1560_vm0, %v1559_v2 }
 0x709   :  { %1448 = vmatprep.subr.bf16.mxu0 %v1559_v2 }
 0x70c   :  { %1449 = vmatpush3.bf16.msra.mxu0 %v818_v9 }
 0x70d   :  { %1462 = vmatprep.subr.mxu0 %v930_v11 }
 0x70f   :  { %1451 = vmatmul.mubr.msk.bf16.vlgmr.msra.gmra.mxu0 %vm134_vm2, %v1666_v47 }
 0x710   :  { %1463 = vmatpush3.msra.mxu0 %v930_v11 }
 0x711   :  { %1464 = vmatprep.subr.mxu0 %v929_v12 }
 0x712   :  { %1465 = vmatpush3.msra.mxu0 %v929_v12 }
 0x713   :  { %1466 = vmatprep.subr.mxu0 %v928_v13 }
 0x714   :  { %1467 = vmatpush3.msra.mxu0 %v928_v13 }
 0x715   :  { %1468 = vmatprep.subr.mxu0 %v927_v15 }
 0x716   :  { %1469 = vmatpush3.msra.mxu0 %v927_v15 }
 0x717   :  { %1473 = vmatprep.subr.mxu0 %v1559_v2 }
 0x7c7   :  { %v701_v46 = vpop.f32.mrf.mxu0 }
 0x7c8   :  { %v702_v19 = vadd.f32 %v1305_v17, %v701_v46 }
 0x7c9   :  { %v1436_v18 = vpop.f32.mrf.mxu0 }
 0x7ca   :  { %v722_v25 = vmul.f32 %v702_v19, %v702_v19  ;;  %v712_v28 = vsel %vm134_vm2, %v702_v19, 0.0 }
 0x7cb   :  { %v704_v21 = vpop.f32.mrf.mxu0 }
 0x7cc   :  { %v705_v23 = vadd.f32 %v1305_v17, %v704_v21  ;;  %v724_v36 = vsel %vm134_vm2, %v722_v25, 0.0  ;;  %v932_v25 = vstv %s1313_s17 }
 0x7cd   :  { %v1437_v47 = vpop.f32.mrf.mxu0 }
 0x7ce   :  { %v711_v26 = vmul.f32 %v1651_v14, %v705_v23  ;;  %v1561_v47 = vmov 0  }
 0x7cf   :  { %v857_v27 = vpop.f32.mrf.mxu0  ;;  %1502 = vset.pattern.permute.xlu0 %v1561_v47  ;;  %1503 = vset.pattern.permute.xlu1 %v1561_v47 }
 0x7d0   :  { %v713_v29 = vsel %vm134_vm2, %v711_v26, 0.0  ;;  %v723_v30 = vmul.f32 %v711_v26, %v705_v23  ;;  %v864_v31 = vadd.f32 %v857_v27, %v812_v24 }
 0x7d1   :  { %v714_v33 = vadd.f32 %v713_v29, %v712_v28  ;;  %v1452_v34 = vpop.f32.mrf.mxu0  ;;  %v1321_v29 = vld [vmem:[%s1756_s4] sm:$0xff]  }
 0x7d2   :  { %v725_v37 = vsel %vm134_vm2, %v723_v30, 0.0  ;;  %v1322_v30 = vunpack.c.l.bf16 %v1321_v29 }
 0x7d3   :  { %v715_v38 = vrot.slane %v714_v33, 4  ;;  %v726_v22 = vadd.f32 %v725_v37, %v724_v36  ;;  %v860_v39 = vpop.f32.mrf.mxu0 }
 0x7d4   :  { %v865_v40 = vadd.f32 %v860_v39, %v813_v35  ;;  %vm1014_vm4 = vcmp.gt.f32.partialorder %v1322_v30, 0.0 }
 0x7d5   :  { %v716_v41 = vadd.f32 %v715_v38, %v714_v33  ;;  %v727_v42 = vrot.slane %v726_v22, 4  ;;  %v1453_v43 = vpop.f32.mrf.mxu0 }
 0x7d7   :  { %v717_v44 = vrot.slane %v716_v41, 2  ;;  %v728_v45 = vadd.f32 %v727_v42, %v726_v22 }
 0x7d9   :  { %v718_v48 = vadd.f32 %v717_v44, %v716_v41  ;;  %v729_v49 = vrot.slane %v728_v45, 2 }
 0x7db   :  { %v719_v50 = vrot.slane %v718_v48, 1  ;;  %v730_v51 = vadd.f32 %v729_v49, %v728_v45 }
 0x7dd   :  { %v720_v52 = vadd.f32 %v719_v50, %v718_v48  ;;  %v731_v53 = vrot.slane %v730_v51, 1 }
 0x7df   :  { %v721_v32 = vmul.f32 0.083333336, %v720_v52  ;;  %v732_v54 = vadd.f32 %v731_v53, %v730_v51 }
 0x7e1   :  { %v733_v55 = vmul.f32 0.083333336, %v732_v54  ;;  %v734_v4 = vmul.f32 %v721_v32, %v721_v32  ;;  %v737_v59 = vsub.f32 %v702_v19, %v721_v32  ;;  %v738_v60 = vsub.f32 %v705_v23, %v721_v32 }
 0x7e3   :  { %v735_v56 = vsub.f32 %v733_v55, %v734_v4 }
 0x7e5   :  { %v736_v57 = vmax.f32 %v735_v56, 0.0  ;;  %v921_v56 = vld [vmem:[%s1755_s3] sm:$0xf] }
 0x7e7   :  { %v739_v58 = vadd.f32 1e-05, %v736_v57 }
 0x7e9   :  { %1511 = vrsqrt.f32 %v739_v58  ;;  %v922_v58 = vunpack.c.l.bf16 %v921_v56 }
 0x7f6   :  { %v1512_v61 = vpop.eup %1511 }
 0x7f7   :  { %v741_v63 = vmul.f32 %v1512_v61, %v737_v59  ;;  %v742_v0 = vmul.f32 %v1512_v61, %v738_v60 }
 0x7f9   :  { %v747_v3 = vmul.f32 %v1307_v62, %v741_v63  ;;  %v748_v5 = vmul.f32 %v1307_v62, %v742_v0  ;;  %v1221_v63 = vld [vmem:[#allocation5 + $0x1c8] sm:$0xff]  ;;  %v1222_v0 = vld [vmem:[#allocation5 + $0x1d0] sm:$0xff] }
 0x7fb   :  { %v753_v6 = vadd.f32 %v1308_v1, %v747_v3  ;;  %v754_v7 = vadd.f32 %v1308_v1, %v748_v5  ;;  %v1225_v3 = vpack.c.bf16 %v1222_v0, %v1221_v63 }
 0x7fd   :  { %v755_v8 = vmax.f32 %v753_v6, 0.0  ;;  %v756_v9 = vmax.f32 %v754_v7, 0.0  ;;  %v1219_v7 = vld [vmem:[#allocation5 + $0x1b8] sm:$0xff] }
 0x7ff   :  { %v870_v10 = vpack.c.bf16 %v756_v9, %v755_v8  ;;  %v1220_v8 = vld [vmem:[#allocation5 + $0x1c0] sm:$0xff] }
 0x800   :  { %v1224_v9 = vpack.c.bf16 %v1220_v8, %v1219_v7 }
 0x801   :  { %1459 = vmatmul.mubr.msk.bf16.vlgmr.msra.gmra.mxu1 %vm134_vm2, %v870_v10 }
 0x802   :  { %1484 = vmatprep.mubr.msk.f32.mxu1 %vm1560_vm0, %v1559_v2 }
 0x8c1   :  { %v910_v16 = vpop.f32.mrf.mxu1 }
 0x8c2   :  { %v1715_v17 = vadd.f32 %v910_v16, %v864_v31  ;;  %v1323_v31 = vunpack.c.h.bf16 %v1321_v29 }
 0x8c3   :  { %v1460_v46 = vpop.f32.mrf.mxu1 }
 0x8c4   :  { %v919_v18 = vmax.f32 %v1715_v17, 0.0  ;;  %vm1015_vm5 = vcmp.gt.f32.partialorder %v1323_v31, 0.0  ;;  %v1318_v17 = vld [vmem:[#allocation5 + $0x1d8] ss:$0 sm:$0xff] }
 0x8c5   :  { %v913_v19 = vpop.f32.mrf.mxu1 }
 0x8c6   :  { %v1718_v20 = vadd.f32 %v913_v19, %v865_v40  ;;  %1470 = vmatprep.mubr.msk.f32.mxu0 %vm134_vm2, %v919_v18 }
 0x8c7   :  { %v1461_v21 = vpop.f32.mrf.mxu1 }
 0x8c8   :  { %v920_v23 = vmax.f32 %v1718_v20, 0.0 }
 0x8ca   :  { %1471 = vmatmul.mubr.msk.f32.vlgmr.msra.gmra.mxu0 %vm134_vm2, %v920_v23 }
 0x8cb   :  { %1477 = vmatprep.mubr.msk.f32.mxu0 %vm1560_vm0, %v1559_v2 }
 0x98a   :  { %v1472_v24 = vpop.f32.mrf.mxu0 }
 0x98b   :  { %v1011_v28 = vadd.f32 %v1472_v24, %v932_v25 }
 0x98c   :  { %v1005_v26 = vpop.f32.mrf.mxu0 }
 0x98d   :  { %v1006_v27 = vadd.f32 %v1005_v26, %v932_v25 }
 0x98f   :  { %1018 = vperm.xlu0 %1502, %v1006_v27  }
 0x993   :  { %1023 = vperm.xlu0 %1502, %v1011_v28  }
 0xa0a   :  { %v1019_v33 = vpop.permute.xlu0 %1018 }
 0xa0b   :  { %v1026_v34 = vsel %vm1014_vm4, %v1019_v33, -1e+30 }
 0xa0c   :  { %v1029_v37 = vsel %vm1028_vm6, %v1026_v34, -inf }
 0xa0e   :  { %v1024_v35 = vpop.permute.xlu0 %1023 }
 0xa0f   :  { %v1027_v36 = vsel %vm1015_vm5, %v1024_v35, -1e+30 }
 0xa10   :  { %v1030_v38 = vsel %vm1028_vm6, %v1027_v36, -inf }
 0xa11   :  { %v1031_v22 = vmax.f32 %v1029_v37, %v1030_v38 }
 0xa13   :  { %v1032_v39 = vrot.slane %v1031_v22, 4 }
 0xa15   :  { %v1033_v40 = vmax.f32 %v1031_v22, %v1032_v39 }
 0xa17   :  { %v1034_v41 = vrot.slane %v1033_v40, 2 }
 0xa19   :  { %v1035_v42 = vmax.f32 %v1033_v40, %v1034_v41 }
 0xa1b   :  { %v1036_v43 = vrot.slane %v1035_v42, 1 }
 0xa1d   :  { %v1037_v44 = vmax.f32 %v1035_v42, %v1036_v43 }
 0xa1f   :  { %v1039_v45 = vmul.f32 %v1323_v31, %v1037_v44  ;;  %v1038_v49 = vmul.f32 %v1322_v30, %v1037_v44 }
 0xa21   :  { %v1043_v48 = vsel %vm1028_vm6, %v1039_v45, 0.0  ;;  %v1040_v50 = vsel %vm1028_vm6, %v1038_v49, 0.0 }
 0xa22   :  { %1044 = vadd.xlane.f32.xlu1 %v1043_v48 }
 0xa26   :  { %1041 = vadd.xlane.f32.xlu1 %v1040_v50 }
 0xaab   :  { %v1045_v51 = vpop.xlane.xlu1 %1044 }
 0xaac   :  { %v1049_v52 = vsub.f32 %v1011_v28, %v1045_v51 }
 0xaae   :  { %v1051_v53 = vsel %vm1047_vm7, %v1049_v52, -1e+30 }
 0xaaf   :  { %v1054_v32 = vmul.f32 1.442695, %v1051_v53  ;;  %v1042_v54 = vpop.xlane.xlu1 %1041 }
 0xab0   :  { %v1048_v55 = vsub.f32 %v1006_v27, %v1042_v54 }
 0xab1   :  { %1513 = vpow2.f32 %v1054_v32 }
 0xab2   :  { %v1052_v4 = vmul.f32 1.442695, %v1048_v55 }
 0xab4   :  { %1515 = vpow2.f32 %v1052_v4 }
 0xabe   :  { %v1514_v57 = vpop.eup %1513 }
 0xabf   :  { %1137 = vperm.xlu0 %1502, %v1514_v57   ;;  %1474 = vmatpush3.msra.mxu0 %v1514_v57 }
 0xac0   :  { %1475 = vmatprep.subr.mxu0 %v1559_v2 }
 0xac1   :  { %v1516_v14 = vpop.eup %1515 }
 0xac2   :  { %1132 = vperm.xlu1 %1503, %v1516_v14   ;;  %1476 = vmatpush3.msra.mxu0 %v1516_v14 }
 0xac3   :  { %1478 = vmatmul.mubr.msk.f32.vlgmr.msra.gmra.mxu0 %vm75_vm1, %v922_v58  ;;  %1487 = vmatprep.subr.bf16.mxu0 %v1559_v2 }
 0xac4   :  { %1491 = vmatprep.mubr.msk.bf16.mxu0 %vm1560_vm0, %v1559_v2  ;;  %1488 = vmatpush3.bf16.msra.mxu0 %v1225_v3 }
 0xac5   :  { %1489 = vmatprep.subr.bf16.mxu0 %v1559_v2 }
 0xac8   :  { %1490 = vmatpush3.bf16.msra.mxu0 %v1224_v9 }
 0xb3a   :  { %v1138_v59 = vpop.permute.xlu0 %1137 }
 0xb3b   :  { %v1141_v60 = vmul.f32 %v1138_v59, %v920_v23 }
 0xb3d   :  { %1481 = vmatpush3.msra.mxu1 %v1141_v60  ;;  %v1133_v61 = vpop.permute.xlu1 %1132 }
 0xb3e   :  { %v1140_v62 = vmul.f32 %v1133_v61, %v919_v18  ;;  %1482 = vmatprep.subr.mxu1 %v1559_v2 }
 0xb40   :  { %1483 = vmatpush3.msra.mxu1 %v1140_v62 }
 0xb41   :  { %1485 = vmatmul.mubr.msk.f32.vlgmr.msra.gmra.mxu1 %vm75_vm1, %v922_v58 }
 0xb83   :  { %v1125_v1 = vpop.f32.mrf.mxu0 }
 0xb84   :  { %v1129_v5 = vmax.f32 %v1125_v1, 1e-30 }
 0xb85   :  { %v1479_v6 = vpop.f32.mrf.mxu0 }
 0xb86   :  { %1214 = vperm.xlu0 %1502, %v1129_v5  }
 0xc01   :  { %v1215_v10 = vpop.permute.xlu0 %1214  ;;  %v1208_v11 = vpop.f32.mrf.mxu1 }
 0xc02   :  { %1517 = vrcp.f32 %v1215_v10 }
 0xc03   :  { %v1486_v12 = vpop.f32.mrf.mxu1 }
 0xc0f   :  { %v1518_v13 = vpop.eup %1517 }
 0xc10   :  { %v1218_v15 = vmul.f32 %v1518_v13, %v1208_v11 }
 0xc12   :  { %v1223_v16 = vpack.c.bf16 %v1218_v15, %v1218_v15 }
 0xc14   :  { %1492 = vmatmul.mubr.msk.bf16.vlgmr.msra.gmra.mxu0 %vm134_vm2, %v1223_v16 }
 0xcd4   :  { %v1268_v46 = vpop.f32.mrf.mxu0 }
 0xcd5   :  { %v1269_v18 = vadd.f32 %v1318_v17, %v1268_v46 }
 0xcd6   :  { %v1493_v19 = vpop.f32.mrf.mxu0 }
 0xcd7   :  { %v1274_v20 = vmax.f32 %v1269_v18, 0.0 }
 0xcd8   :  { %v1271_v21 = vpop.f32.mrf.mxu0 }
 0xcd9   :  { %1275 = vst [vmem:[%s1758_s6] sm:$0xff] %v1274_v20 }
 0xcda   :  { %v1494_v2 = vpop.f32.mrf.mxu0 }
 0xcdb   :  { %1280 = vsyncpa [#allocation3], 1 }
 0xcdc   :  { %1281 = vsyncpa [#allocation4], 1 }

</bundles_post_ra>
